<compile_context>
chip_gen: v7x
topology: tpu7x:2x2x1
jax: 0.10.0
libtpu: 0.0.40
codegen_flags: <defaults>
</compile_context>

<pallas_src>
import collections
import math

import numpy as np
import jax
import jax.numpy as jnp
from jax.experimental import pallas as pl
from jax.experimental.pallas import tpu as pltpu

# ----------------------------------------------------------------------------
# Config namedtuples (mirroring efficientnet utils)
# ----------------------------------------------------------------------------
GlobalParams = collections.namedtuple(
    "GlobalParams",
    ["width_coefficient", "depth_coefficient", "image_size", "dropout_rate",
     "num_classes", "batch_norm_momentum", "batch_norm_epsilon",
     "drop_connect_rate", "depth_divisor", "min_depth", "include_top"])

BlockArgs = collections.namedtuple(
    "BlockArgs",
    ["num_repeat", "kernel_size", "stride", "expand_ratio",
     "input_filters", "output_filters", "se_ratio", "id_skip"])

GLOBAL_PARAMS = GlobalParams(
    width_coefficient=0.1, depth_coefficient=1.0, image_size=16,
    dropout_rate=0.2, num_classes=1, batch_norm_momentum=0.99,
    batch_norm_epsilon=1e-3, drop_connect_rate=0.0, depth_divisor=8,
    min_depth=None, include_top=True)

BLOCKS_ARGS = [
    BlockArgs(num_repeat=1, kernel_size=3, stride=1, expand_ratio=1,
              input_filters=32, output_filters=16, se_ratio=0.25, id_skip=True),
    BlockArgs(num_repeat=1, kernel_size=3, stride=2, expand_ratio=6,
              input_filters=16, output_filters=24, se_ratio=0.25, id_skip=True),
]


def round_filters(filters, gp):
    multiplier = gp.width_coefficient
    if not multiplier:
        return filters
    divisor = gp.depth_divisor
    min_depth = gp.min_depth
    filters *= multiplier
    min_depth = min_depth or divisor
    new_filters = max(min_depth, int(filters + divisor / 2) // divisor * divisor)
    if new_filters < 0.9 * filters:
        new_filters += divisor
    return int(new_filters)


def round_repeats(repeats, gp):
    multiplier = gp.depth_coefficient
    if not multiplier:
        return repeats
    return int(math.ceil(multiplier * repeats))


# ----------------------------------------------------------------------------
# SAME-padding helpers (TF/EfficientNet static same padding) - host-side glue
# ----------------------------------------------------------------------------
def same_pad_amounts(H, W, k, s):
    Ho = -(-H // s)
    Wo = -(-W // s)
    ph = max((Ho - 1) * s + k - H, 0)
    pw = max((Wo - 1) * s + k - W, 0)
    return Ho, Wo, (ph // 2, ph - ph // 2), (pw // 2, pw - pw // 2)


def stem_im2col(x, k, s):
    """x: NHWC network input.  Returns (N, Ho*Wo, k*k*C) patches (tap-major)."""
    N, H, W, C = x.shape
    Ho, Wo, (pt, pb), (pleft, pright) = same_pad_amounts(H, W, k, s)
    xp = jnp.pad(x, ((0, 0), (pt, pb), (pleft, pright), (0, 0)))
    cols = []
    for ky in range(k):
        for kx in range(k):
            cols.append(xp[:, ky:ky + (Ho - 1) * s + 1:s,
                           kx:kx + (Wo - 1) * s + 1:s, :])
    cols = jnp.stack(cols, axis=3)                      # (N, Ho, Wo, k*k, C)
    return cols.reshape(N, Ho * Wo, k * k * C), Ho, Wo


def make_stride_select(H, W, k, s):
    """Selection matrix S so that  strided-SAME-conv == S @ (stride-1 SAME conv)
    on the flattened (H*W, C) stride-1 output.  Exact for odd k."""
    assert k % 2 == 1
    Ho, Wo, (pt, _), (pleft, _) = same_pad_amounts(H, W, k, s)
    c = (k - 1) // 2
    sel = np.zeros((Ho * Wo, H * W), np.float32)
    for i in range(Ho):
        r = s * i - pt + c
        assert 0 <= r < H
        for j in range(Wo):
            q = s * j - pleft + c
            assert 0 <= q < W
            sel[i * Wo + j, r * W + q] = 1.0
    return jnp.asarray(sel)


# ----------------------------------------------------------------------------
# Parameter construction (deterministic, mirrors module __init__ shapes)
# ----------------------------------------------------------------------------
def bn_affine(c, eps):
    gamma = jnp.ones((c,), jnp.float32)
    beta = jnp.zeros((c,), jnp.float32)
    mean = jnp.zeros((c,), jnp.float32)
    var = jnp.ones((c,), jnp.float32)
    scale = gamma / jnp.sqrt(var + eps)
    shift = beta - mean * scale
    return scale, shift


def spectral_normalize(w, key, n_iter=1):
    out_c = w.shape[0]
    w_mat = w.reshape(out_c, -1)
    u = jax.random.normal(key, (out_c,), jnp.float32)
    u = u / (jnp.linalg.norm(u) + 1e-12)
    v = None
    for _ in range(n_iter):
        v = w_mat.T @ u
        v = v / (jnp.linalg.norm(v) + 1e-12)
        u = w_mat @ v
        u = u / (jnp.linalg.norm(u) + 1e-12)
    sigma = u @ (w_mat @ v)
    return w / sigma


def make_block_params(ba, gp, kit):
    eps = gp.batch_norm_epsilon
    inp = ba.input_filters
    oup = inp * ba.expand_ratio
    k = ba.kernel_size
    bp = {"expand_ratio": ba.expand_ratio, "k": k, "s": ba.stride,
          "id_skip": ba.id_skip, "inp": inp, "out_f": ba.output_filters,
          "has_se": (ba.se_ratio is not None) and (0 < ba.se_ratio <= 1)}
    if ba.expand_ratio != 1:
        w = 0.1 * jax.random.normal(next(kit), (oup, inp, 1, 1), jnp.float32)
        bp["expand_w"] = w.reshape(oup, inp).T                      # (inp, oup)
        bp["bn0"] = bn_affine(oup, eps)
    w = 0.1 * jax.random.normal(next(kit), (oup, 1, k, k), jnp.float32)
    bp["dw_w"] = jnp.transpose(w[:, 0], (1, 2, 0)).reshape(k * k, oup)
    bp["bn1"] = bn_affine(oup, eps)
    if bp["has_se"]:
        nsq = max(1, int(inp * ba.se_ratio))
        w = 0.1 * jax.random.normal(next(kit), (nsq, oup, 1, 1), jnp.float32)
        bp["se_r_w"] = w.reshape(nsq, oup).T                        # (oup, nsq)
        bp["se_r_b"] = 0.01 * jax.random.normal(next(kit), (nsq,), jnp.float32)
        w = 0.1 * jax.random.normal(next(kit), (oup, nsq, 1, 1), jnp.float32)
        bp["se_e_w"] = w.reshape(oup, nsq).T                        # (nsq, oup)
        bp["se_e_b"] = 0.01 * jax.random.normal(next(kit), (oup,), jnp.float32)
    w = 0.1 * jax.random.normal(next(kit), (ba.output_filters, oup, 1, 1),
                                jnp.float32)
    bp["proj_w"] = w.reshape(ba.output_filters, oup).T              # (oup, out)
    bp["bn2"] = bn_affine(ba.output_filters, eps)
    return bp


def build_params(blocks_args, gp, outputN, key):
    kit = iter(jax.random.split(key, 256))
    eps = gp.batch_norm_epsilon
    params = {}

    stem_out = round_filters(32, gp)
    w = 0.1 * jax.random.normal(next(kit), (stem_out, 3, 3, 3), jnp.float32)
    w = spectral_normalize(w, next(kit))              # spectral_norm(conv_stem)
    params["stem_w"] = jnp.transpose(w, (2, 3, 1, 0)).reshape(3 * 3 * 3, stem_out)
    params["stem_bn"] = bn_affine(stem_out, eps)

    blocks = []
    last_out = stem_out
    for ba in blocks_args:
        ba = ba._replace(input_filters=round_filters(ba.input_filters, gp),
                         output_filters=round_filters(ba.output_filters, gp),
                         num_repeat=round_repeats(ba.num_repeat, gp))
        blocks.append(make_block_params(ba, gp, kit))
        if ba.num_repeat > 1:
            ba = ba._replace(input_filters=ba.output_filters, stride=1)
        for _ in range(ba.num_repeat - 1):
            blocks.append(make_block_params(ba, gp, kit))
        last_out = ba.output_filters
    params["blocks"] = blocks

    head_out = round_filters(1280, gp)
    w = 0.1 * jax.random.normal(next(kit), (head_out, last_out, 1, 1), jnp.float32)
    w = spectral_normalize(w, next(kit))              # spectral_norm(conv_head)
    params["head_w"] = w.reshape(head_out, last_out).T               # (last, head)
    if gp.include_top:
        wfc = 0.1 * jax.random.normal(next(kit), (outputN, head_out), jnp.float32)
        params["fc_w"] = wfc.T                                       # (head, outN)
        params["fc_b"] = 0.01 * jax.random.normal(next(kit), (outputN,), jnp.float32)
    return params


# ----------------------------------------------------------------------------
# Fold BN / last-projection+head and flatten params for the fused kernel
# ----------------------------------------------------------------------------
def prepare_fused(params, gp, stem_hw):
    flat, names = [], []

    def add(name, a):
        names.append(name)
        flat.append(jnp.asarray(a, jnp.float32))

    sc, sh = params["stem_bn"]
    add("stem_w", params["stem_w"] * sc[None, :])
    add("stem_b", sh.reshape(1, -1))

    blocks_cfg = []
    curH, curW = stem_hw
    nb = len(params["blocks"])
    for bi, bp in enumerate(params["blocks"]):
        k, s = bp["k"], bp["s"]
        expand = bp["expand_ratio"] != 1
        Cin, Cout = bp["inp"], bp["out_f"]
        Cmid = Cin * bp["expand_ratio"]
        skip = bp["id_skip"] and s == 1 and Cin == Cout
        fold_head = (bi == nb - 1) and (not skip)
        if expand:
            sc, sh = bp["bn0"]
            add(f"b{bi}_exp_w", bp["expand_w"] * sc[None, :])
            add(f"b{bi}_exp_b", sh.reshape(1, -1))
        sc, sh = bp["bn1"]
        add(f"b{bi}_dw_w", bp["dw_w"] * sc[None, :])
        add(f"b{bi}_dw_b", sh.reshape(1, -1))
        Ho, Wo, _, _ = same_pad_amounts(curH, curW, k, s)
        if s > 1:
            add(f"b{bi}_sel", make_stride_select(curH, curW, k, s))
        if bp["has_se"]:
            add(f"b{bi}_se_r_w", bp["se_r_w"])
            add(f"b{bi}_se_r_b", bp["se_r_b"].reshape(1, -1))
            add(f"b{bi}_se_e_w", bp["se_e_w"])
            add(f"b{bi}_se_e_b", bp["se_e_b"].reshape(1, -1))
        sc, sh = bp["bn2"]
        pw = bp["proj_w"] * sc[None, :]
        pb = sh.reshape(1, -1)
        if fold_head:
            # ((A @ P)*sc + sh) @ H  ==  A @ (P*sc @ H) + sh @ H
            add("ph_w", pw @ params["head_w"])
            add("ph_b", pb @ params["head_w"])
        else:
            add(f"b{bi}_proj_w", pw)
            add(f"b{bi}_proj_b", pb)
        blocks_cfg.append(dict(expand=expand, k=k, s=s, H=curH, W=curW,
                               Cmid=Cmid, has_se=bp["has_se"], skip=skip,
                               fold_head=fold_head))
        curH, curW = Ho, Wo

    head_folded = blocks_cfg[-1]["fold_head"]
    if not head_folded:
        add("head_w", params["head_w"])
    add("fc_w", params["fc_w"])
    add("fc_b", params["fc_b"].reshape(1, -1))
    return flat, names, blocks_cfg, head_folded


# ----------------------------------------------------------------------------
# The fused Pallas kernel (one grid step == one batch sample, all in VMEM)
# ----------------------------------------------------------------------------
def make_fused_kernel(names, blocks_cfg, head_folded):
    n_params = len(names)

    def swish(v):
        return v * jax.nn.sigmoid(v)

    def kernel(*refs):
        stem_ref = refs[0]
        prefs = dict(zip(names, refs[1:1 + n_params]))
        o_ref = refs[1 + n_params]
        pad_refs = refs[2 + n_params:]

        # stem: im2col GEMM (BN folded) + swish
        y = jnp.dot(stem_ref[...], prefs["stem_w"][...],
                    preferred_element_type=jnp.float32) + prefs["stem_b"][...]
        x = swish(y)                                         # (H0*W0, C0)

        for bi, b in enumerate(blocks_cfg):
            res = x
            H, W, k, s, C = b["H"], b["W"], b["k"], b["s"], b["Cmid"]

            if b["expand"]:                                  # 1x1 expand + BN + swish
                y = jnp.dot(x, prefs[f"b{bi}_exp_w"][...],
                            preferred_element_type=jnp.float32)
                y = y + prefs[f"b{bi}_exp_b"][...]
                x = swish(y)

            # depthwise conv: zero-pad into VMEM scratch, unrolled k*k FMA taps.
            p = (k - 1) // 2
            pad_ref = pad_refs[bi]
            pad_ref[...] = jnp.zeros(pad_ref.shape, jnp.float32)
            pad_ref[p:p + H, p:p + W, :] = x.reshape(H, W, C)
            dw_w = prefs[f"b{bi}_dw_w"]
            acc = None
            for ky in range(k):
                for kx in range(k):
                    t = ky * k + kx
                    term = pad_ref[ky:ky + H, kx:kx + W, :] * dw_w[t:t + 1, :]
                    acc = term if acc is None else acc + term
            y = acc.reshape(H * W, C)
            if s > 1:
                # strided SAME conv == constant selection of the stride-1 output
                y = jnp.dot(prefs[f"b{bi}_sel"][...], y,
                            preferred_element_type=jnp.float32)
            y = y + prefs[f"b{bi}_dw_b"][...]
            x = swish(y)                                     # (Ho*Wo, C)

            if b["has_se"]:                                  # fused SE (pool+FCs+gate)
                pooled = jnp.mean(x, axis=0, keepdims=True)  # (1, C)
                z = jnp.dot(pooled, prefs[f"b{bi}_se_r_w"][...],
                            preferred_element_type=jnp.float32)
                z = swish(z + prefs[f"b{bi}_se_r_b"][...])
                z = jnp.dot(z, prefs[f"b{bi}_se_e_w"][...],
                            preferred_element_type=jnp.float32)
                z = z + prefs[f"b{bi}_se_e_b"][...]
                x = x * jax.nn.sigmoid(z)

            if b["fold_head"]:
                # projection+BN folded into the head conv; head swish (no _bn1)
                y = jnp.dot(x, prefs["ph_w"][...],
                            preferred_element_type=jnp.float32) + prefs["ph_b"][...]
                x = swish(y)
            else:
                x = jnp.dot(x, prefs[f"b{bi}_proj_w"][...],
                            preferred_element_type=jnp.float32)
                x = x + prefs[f"b{bi}_proj_b"][...]
                if b["skip"]:
                    x = x + res                              # identity skip

        if not head_folded:
            y = jnp.dot(x, prefs["head_w"][...], preferred_element_type=jnp.float32)
            x = swish(y)

        # global average pool + final linear (Dropout is identity in eval mode)
        pooled = jnp.mean(x, axis=0, keepdims=True)          # (1, Ch)
        logits = jnp.dot(pooled, prefs["fc_w"][...],
                         preferred_element_type=jnp.float32) + prefs["fc_b"][...]
        o_ref[...] = logits

    return kernel


def efficientnet_forward(params, x_nchw, gp):
    assert gp.include_top
    x = jnp.transpose(x_nchw, (0, 2, 3, 1)).astype(jnp.float32)     # NHWC
    N = x.shape[0]
    cols, Ho, Wo = stem_im2col(x, 3, 2)                             # (N, Ho*Wo, 27)
    flat, names, blocks_cfg, head_folded = prepare_fused(params, gp, (Ho, Wo))
    out_n = params["fc_w"].shape[1]
    kernel = make_fused_kernel(names, blocks_cfg, head_folded)

    def const_spec(arr):
        zeros = (0,) * arr.ndim
        return pl.BlockSpec(arr.shape, lambda n, _z=zeros: _z)

    in_specs = [pl.BlockSpec((None,) + tuple(cols.shape[1:]), lambda n: (n, 0, 0))]
    in_specs += [const_spec(a) for a in flat]

    scratch = [pltpu.VMEM((b["H"] + b["k"] - 1, b["W"] + b["k"] - 1, b["Cmid"]),
                          jnp.float32) for b in blocks_cfg]

    out = pl.pallas_call(
        kernel,
        out_shape=jax.ShapeDtypeStruct((N, 1, out_n), jnp.float32),
        grid=(N,),
        in_specs=in_specs,
        out_specs=pl.BlockSpec((None, 1, out_n), lambda n: (n, 0, 0)),
        scratch_shapes=scratch,
        compiler_params=pltpu.CompilerParams(dimension_semantics=("parallel",)),
    )(cols, *flat)
    return out.reshape(N, out_n)


# ----------------------------------------------------------------------------
# Pure-JAX reference (lax.conv based) for correctness checking
# ----------------------------------------------------------------------------
def _conv_same_nhwc(x, w_hwio, stride, groups=1):
    _, H, W, _ = x.shape
    k = w_hwio.shape[0]
    _, _, (pt, pb), (pleft, pright) = same_pad_amounts(H, W, k, stride)
    return jax.lax.conv_general_dilated(
        x, w_hwio, window_strides=(stride, stride),
        padding=((pt, pb), (pleft, pright)),
        dimension_numbers=("NHWC", "HWIO", "NHWC"),
        feature_group_count=groups)


def reference_forward(params, x_nchw, gp):
    x = jnp.transpose(x_nchw, (0, 2, 3, 1)).astype(jnp.float32)
    c_in = x.shape[-1]
    stem_w = params["stem_w"].reshape(3, 3, c_in, -1)
    x = _conv_same_nhwc(x, stem_w, 2)
    sc, sh = params["stem_bn"]
    x = x * sc + sh
    x = x * jax.nn.sigmoid(x)
    for bp in params["blocks"]:
        inputs = x
        if bp["expand_ratio"] != 1:
            y = jnp.einsum("nhwc,cd->nhwd", x, bp["expand_w"])
            sc, sh = bp["bn0"]
            y = y * sc + sh
            x = y * jax.nn.sigmoid(y)
        C = x.shape[-1]
        k, s = bp["k"], bp["s"]
        wdw = bp["dw_w"].reshape(k, k, 1, C)
        y = _conv_same_nhwc(x, wdw, s, groups=C)
        sc, sh = bp["bn1"]
        y = y * sc + sh
        x = y * jax.nn.sigmoid(y)
        if bp["has_se"]:
            pooled = jnp.mean(x, axis=(1, 2))
            z = pooled @ bp["se_r_w"] + bp["se_r_b"]
            z = z * jax.nn.sigmoid(z)
            z = z @ bp["se_e_w"] + bp["se_e_b"]
            x = x * jax.nn.sigmoid(z)[:, None, None, :]
        y = jnp.einsum("nhwc,cd->nhwd", x, bp["proj_w"])
        sc, sh = bp["bn2"]
        x = y * sc + sh
        if bp["id_skip"] and s == 1 and bp["inp"] == bp["out_f"]:
            x = x + inputs
    y = jnp.einsum("nhwc,cd->nhwd", x, params["head_w"])
    x = y * jax.nn.sigmoid(y)                       # swish(conv_head(x)), no _bn1
    pooled = jnp.mean(x, axis=(1, 2))
    return pooled @ params["fc_w"] + params["fc_b"]


# ----------------------------------------------------------------------------
if __name__ == "__main__":
    key = jax.random.PRNGKey(0)
    k_in, k_w = jax.random.split(key)
    x = jax.random.normal(k_in, (2, 3, 16, 16), jnp.float32)     # NCHW input
    params = build_params(BLOCKS_ARGS, GLOBAL_PARAMS, 1, k_w)

    out = efficientnet_forward(params, x, GLOBAL_PARAMS)
    out = jax.block_until_ready(out)
    assert out.shape == (2, 1), out.shape
    assert bool(jnp.all(jnp.isfinite(out)))

    ref = reference_forward(params, x, GLOBAL_PARAMS)
    assert bool(jnp.allclose(out, ref, rtol=2e-3, atol=2e-3)), (out, ref)
    print("KERNEL_OK")
</pallas_src>

<mosaic_0001>
module attributes {stable_mosaic.version = 11 : i64} {
  func.func @kernel(%arg0: i32, %arg1: memref<1x64x27xf32, #tpu.memory_space<vmem>>, %arg2: memref<27x8xf32, #tpu.memory_space<vmem>>, %arg3: memref<1x8xf32, #tpu.memory_space<vmem>>, %arg4: memref<9x8xf32, #tpu.memory_space<vmem>>, %arg5: memref<1x8xf32, #tpu.memory_space<vmem>>, %arg6: memref<8x2xf32, #tpu.memory_space<vmem>>, %arg7: memref<1x2xf32, #tpu.memory_space<vmem>>, %arg8: memref<2x8xf32, #tpu.memory_space<vmem>>, %arg9: memref<1x8xf32, #tpu.memory_space<vmem>>, %arg10: memref<8x8xf32, #tpu.memory_space<vmem>>, %arg11: memref<1x8xf32, #tpu.memory_space<vmem>>, %arg12: memref<8x48xf32, #tpu.memory_space<vmem>>, %arg13: memref<1x48xf32, #tpu.memory_space<vmem>>, %arg14: memref<9x48xf32, #tpu.memory_space<vmem>>, %arg15: memref<1x48xf32, #tpu.memory_space<vmem>>, %arg16: memref<16x64xf32, #tpu.memory_space<vmem>>, %arg17: memref<48x2xf32, #tpu.memory_space<vmem>>, %arg18: memref<1x2xf32, #tpu.memory_space<vmem>>, %arg19: memref<2x48xf32, #tpu.memory_space<vmem>>, %arg20: memref<1x48xf32, #tpu.memory_space<vmem>>, %arg21: memref<48x128xf32, #tpu.memory_space<vmem>>, %arg22: memref<1x128xf32, #tpu.memory_space<vmem>>, %arg23: memref<128x1xf32, #tpu.memory_space<vmem>>, %arg24: memref<1x1xf32, #tpu.memory_space<vmem>>, %arg25: memref<1x1x1xf32, #tpu.memory_space<vmem>>, %arg26: memref<10x10x8xf32, #tpu.memory_space<vmem>>, %arg27: memref<10x10x48xf32, #tpu.memory_space<vmem>>) attributes {dimension_semantics = [#tpu.dimension_semantics<parallel>], iteration_bounds = array<i64: 2>, scalar_prefetch = 0 : i64, scratch_operands = 2 : i64, tpu.core_type = #tpu.core_type<tc>, window_params = [{transform_indices = @transform_0, window_bounds = array<i64: 1, 64, 27>}, {pipeline_mode = #tpu.pipeline_mode<synchronous>, transform_indices = @transform_1, window_bounds = array<i64: 27, 8>}, {pipeline_mode = #tpu.pipeline_mode<synchronous>, transform_indices = @transform_2, window_bounds = array<i64: 1, 8>}, {pipeline_mode = #tpu.pipeline_mode<synchronous>, transform_indices = @transform_3, window_bounds = array<i64: 9, 8>}, {pipeline_mode = #tpu.pipeline_mode<synchronous>, transform_indices = @transform_4, window_bounds = array<i64: 1, 8>}, {pipeline_mode = #tpu.pipeline_mode<synchronous>, transform_indices = @transform_5, window_bounds = array<i64: 8, 2>}, {pipeline_mode = #tpu.pipeline_mode<synchronous>, transform_indices = @transform_6, window_bounds = array<i64: 1, 2>}, {pipeline_mode = #tpu.pipeline_mode<synchronous>, transform_indices = @transform_7, window_bounds = array<i64: 2, 8>}, {pipeline_mode = #tpu.pipeline_mode<synchronous>, transform_indices = @transform_8, window_bounds = array<i64: 1, 8>}, {pipeline_mode = #tpu.pipeline_mode<synchronous>, transform_indices = @transform_9, window_bounds = array<i64: 8, 8>}, {pipeline_mode = #tpu.pipeline_mode<synchronous>, transform_indices = @transform_10, window_bounds = array<i64: 1, 8>}, {pipeline_mode = #tpu.pipeline_mode<synchronous>, transform_indices = @transform_11, window_bounds = array<i64: 8, 48>}, {pipeline_mode = #tpu.pipeline_mode<synchronous>, transform_indices = @transform_12, window_bounds = array<i64: 1, 48>}, {pipeline_mode = #tpu.pipeline_mode<synchronous>, transform_indices = @transform_13, window_bounds = array<i64: 9, 48>}, {pipeline_mode = #tpu.pipeline_mode<synchronous>, transform_indices = @transform_14, window_bounds = array<i64: 1, 48>}, {pipeline_mode = #tpu.pipeline_mode<synchronous>, transform_indices = @transform_15, window_bounds = array<i64: 16, 64>}, {pipeline_mode = #tpu.pipeline_mode<synchronous>, transform_indices = @transform_16, window_bounds = array<i64: 48, 2>}, {pipeline_mode = #tpu.pipeline_mode<synchronous>, transform_indices = @transform_17, window_bounds = array<i64: 1, 2>}, {pipeline_mode = #tpu.pipeline_mode<synchronous>, transform_indices = @transform_18, window_bounds = array<i64: 2, 48>}, {pipeline_mode = #tpu.pipeline_mode<synchronous>, transform_indices = @transform_19, window_bounds = array<i64: 1, 48>}, {pipeline_mode = #tpu.pipeline_mode<synchronous>, transform_indices = @transform_20, window_bounds = array<i64: 48, 128>}, {pipeline_mode = #tpu.pipeline_mode<synchronous>, transform_indices = @transform_21, window_bounds = array<i64: 1, 128>}, {pipeline_mode = #tpu.pipeline_mode<synchronous>, transform_indices = @transform_22, window_bounds = array<i64: 128, 1>}, {pipeline_mode = #tpu.pipeline_mode<synchronous>, transform_indices = @transform_23, window_bounds = array<i64: 1, 1>}, {transform_indices = @transform_24, window_bounds = array<i64: 1, 1, 1>}]} {
    %c0 = arith.constant 0 : index
    %c0_0 = arith.constant 0 : index
    %c0_1 = arith.constant 0 : index
    %0 = vector.load %arg1[%c0, %c0_0, %c0_1] : memref<1x64x27xf32, #tpu.memory_space<vmem>>, vector<1x64x27xf32>
    %1 = vector.shape_cast %0 : vector<1x64x27xf32> to vector<64x27xf32>
    %c0_2 = arith.constant 0 : index
    %c0_3 = arith.constant 0 : index
    %2 = vector.load %arg2[%c0_2, %c0_3] : memref<27x8xf32, #tpu.memory_space<vmem>>, vector<27x8xf32>
    %cst = arith.constant dense<0.000000e+00> : vector<64x8xf32>
    %3 = tpu.matmul %1, %2, %cst {dimension_numbers = #tpu.dot_dimension_numbers<[1], [0], [0], [1], [0, 0, 1, 1], [], []>} : vector<64x27xf32>, vector<27x8xf32>, vector<64x8xf32> -> vector<64x8xf32>
    %c0_4 = arith.constant 0 : index
    %c0_5 = arith.constant 0 : index
    %4 = vector.load %arg3[%c0_4, %c0_5] : memref<1x8xf32, #tpu.memory_space<vmem>>, vector<1x8xf32>
    %5 = vector.broadcast %4 : vector<1x8xf32> to vector<64x8xf32>
    %6 = arith.addf %3, %5 : vector<64x8xf32>
    %7 = arith.negf %6 : vector<64x8xf32>
    %8 = math.exp %7 : vector<64x8xf32>
    %cst_6 = arith.constant 1.000000e+00 : f32
    %9 = vector.broadcast %cst_6 : f32 to vector<64x8xf32>
    %10 = arith.addf %9, %8 : vector<64x8xf32>
    %11 = arith.divf %9, %10 : vector<64x8xf32>
    %12 = arith.mulf %6, %11 : vector<64x8xf32>
    %cst_7 = arith.constant 0.000000e+00 : f32
    %13 = vector.broadcast %cst_7 : f32 to vector<10x10x8xf32>
    %c0_8 = arith.constant 0 : index
    %c0_9 = arith.constant 0 : index
    %c0_10 = arith.constant 0 : index
    %14 = vector.load %arg26[%c0_8, %c0_9, %c0_10] : memref<10x10x8xf32, #tpu.memory_space<vmem>>, vector<10x10x8xf32>
    tpu.vector_store %arg26[%c0_8, %c0_9, %c0_10], %13 {strides = array<i32>} : memref<10x10x8xf32, #tpu.memory_space<vmem>>, vector<10x10x8xf32>,
    %15 = vector.shape_cast %12 : vector<64x8xf32> to vector<8x8x8xf32>
    %c1 = arith.constant 1 : index
    %c1_11 = arith.constant 1 : index
    %c0_12 = arith.constant 0 : index
    %16 = vector.load %arg26[%c1, %c1_11, %c0_12] : memref<10x10x8xf32, #tpu.memory_space<vmem>>, vector<8x8x8xf32>
    tpu.vector_store %arg26[%c1, %c1_11, %c0_12], %15 {strides = array<i32>} : memref<10x10x8xf32, #tpu.memory_space<vmem>>, vector<8x8x8xf32>,
    %c0_13 = arith.constant 0 : index
    %c0_14 = arith.constant 0 : index
    %c0_15 = arith.constant 0 : index
    %17 = vector.load %arg26[%c0_13, %c0_14, %c0_15] : memref<10x10x8xf32, #tpu.memory_space<vmem>>, vector<8x8x8xf32>
    %c0_16 = arith.constant 0 : index
    %c0_17 = arith.constant 0 : index
    %18 = vector.load %arg4[%c0_16, %c0_17] : memref<9x8xf32, #tpu.memory_space<vmem>>, vector<1x8xf32>
    %19 = vector.shape_cast %18 : vector<1x8xf32> to vector<1x1x8xf32>
    %20 = vector.broadcast %19 : vector<1x1x8xf32> to vector<8x8x8xf32>
    %21 = arith.mulf %17, %20 : vector<8x8x8xf32>
    %c0_18 = arith.constant 0 : index
    %c1_19 = arith.constant 1 : index
    %c0_20 = arith.constant 0 : index
    %22 = vector.load %arg26[%c0_18, %c1_19, %c0_20] : memref<10x10x8xf32, #tpu.memory_space<vmem>>, vector<8x8x8xf32>
    %c1_21 = arith.constant 1 : index
    %c0_22 = arith.constant 0 : index
    %23 = vector.load %arg4[%c1_21, %c0_22] : memref<9x8xf32, #tpu.memory_space<vmem>>, vector<1x8xf32>
    %24 = vector.shape_cast %23 : vector<1x8xf32> to vector<1x1x8xf32>
    %25 = vector.broadcast %24 : vector<1x1x8xf32> to vector<8x8x8xf32>
    %26 = arith.mulf %22, %25 : vector<8x8x8xf32>
    %27 = arith.addf %21, %26 : vector<8x8x8xf32>
    %c0_23 = arith.constant 0 : index
    %c2 = arith.constant 2 : index
    %c0_24 = arith.constant 0 : index
    %28 = vector.load %arg26[%c0_23, %c2, %c0_24] : memref<10x10x8xf32, #tpu.memory_space<vmem>>, vector<8x8x8xf32>
    %c2_25 = arith.constant 2 : index
    %c0_26 = arith.constant 0 : index
    %29 = vector.load %arg4[%c2_25, %c0_26] : memref<9x8xf32, #tpu.memory_space<vmem>>, vector<1x8xf32>
    %30 = vector.shape_cast %29 : vector<1x8xf32> to vector<1x1x8xf32>
    %31 = vector.broadcast %30 : vector<1x1x8xf32> to vector<8x8x8xf32>
    %32 = arith.mulf %28, %31 : vector<8x8x8xf32>
    %33 = arith.addf %27, %32 : vector<8x8x8xf32>
    %c1_27 = arith.constant 1 : index
    %c0_28 = arith.constant 0 : index
    %c0_29 = arith.constant 0 : index
    %34 = vector.load %arg26[%c1_27, %c0_28, %c0_29] : memref<10x10x8xf32, #tpu.memory_space<vmem>>, vector<8x8x8xf32>
    %c3 = arith.constant 3 : index
    %c0_30 = arith.constant 0 : index
    %35 = vector.load %arg4[%c3, %c0_30] : memref<9x8xf32, #tpu.memory_space<vmem>>, vector<1x8xf32>
    %36 = vector.shape_cast %35 : vector<1x8xf32> to vector<1x1x8xf32>
    %37 = vector.broadcast %36 : vector<1x1x8xf32> to vector<8x8x8xf32>
    %38 = arith.mulf %34, %37 : vector<8x8x8xf32>
    %39 = arith.addf %33, %38 : vector<8x8x8xf32>
    %c1_31 = arith.constant 1 : index
    %c1_32 = arith.constant 1 : index
    %c0_33 = arith.constant 0 : index
    %40 = vector.load %arg26[%c1_31, %c1_32, %c0_33] : memref<10x10x8xf32, #tpu.memory_space<vmem>>, vector<8x8x8xf32>
    %c4 = arith.constant 4 : index
    %c0_34 = arith.constant 0 : index
    %41 = vector.load %arg4[%c4, %c0_34] : memref<9x8xf32, #tpu.memory_space<vmem>>, vector<1x8xf32>
    %42 = vector.shape_cast %41 : vector<1x8xf32> to vector<1x1x8xf32>
    %43 = vector.broadcast %42 : vector<1x1x8xf32> to vector<8x8x8xf32>
    %44 = arith.mulf %40, %43 : vector<8x8x8xf32>
    %45 = arith.addf %39, %44 : vector<8x8x8xf32>
    %c1_35 = arith.constant 1 : index
    %c2_36 = arith.constant 2 : index
    %c0_37 = arith.constant 0 : index
    %46 = vector.load %arg26[%c1_35, %c2_36, %c0_37] : memref<10x10x8xf32, #tpu.memory_space<vmem>>, vector<8x8x8xf32>
    %c5 = arith.constant 5 : index
    %c0_38 = arith.constant 0 : index
    %47 = vector.load %arg4[%c5, %c0_38] : memref<9x8xf32, #tpu.memory_space<vmem>>, vector<1x8xf32>
    %48 = vector.shape_cast %47 : vector<1x8xf32> to vector<1x1x8xf32>
    %49 = vector.broadcast %48 : vector<1x1x8xf32> to vector<8x8x8xf32>
    %50 = arith.mulf %46, %49 : vector<8x8x8xf32>
    %51 = arith.addf %45, %50 : vector<8x8x8xf32>
    %c2_39 = arith.constant 2 : index
    %c0_40 = arith.constant 0 : index
    %c0_41 = arith.constant 0 : index
    %52 = vector.load %arg26[%c2_39, %c0_40, %c0_41] : memref<10x10x8xf32, #tpu.memory_space<vmem>>, vector<8x8x8xf32>
    %c6 = arith.constant 6 : index
    %c0_42 = arith.constant 0 : index
    %53 = vector.load %arg4[%c6, %c0_42] : memref<9x8xf32, #tpu.memory_space<vmem>>, vector<1x8xf32>
    %54 = vector.shape_cast %53 : vector<1x8xf32> to vector<1x1x8xf32>
    %55 = vector.broadcast %54 : vector<1x1x8xf32> to vector<8x8x8xf32>
    %56 = arith.mulf %52, %55 : vector<8x8x8xf32>
    %57 = arith.addf %51, %56 : vector<8x8x8xf32>
    %c2_43 = arith.constant 2 : index
    %c1_44 = arith.constant 1 : index
    %c0_45 = arith.constant 0 : index
    %58 = vector.load %arg26[%c2_43, %c1_44, %c0_45] : memref<10x10x8xf32, #tpu.memory_space<vmem>>, vector<8x8x8xf32>
    %c7 = arith.constant 7 : index
    %c0_46 = arith.constant 0 : index
    %59 = vector.load %arg4[%c7, %c0_46] : memref<9x8xf32, #tpu.memory_space<vmem>>, vector<1x8xf32>
    %60 = vector.shape_cast %59 : vector<1x8xf32> to vector<1x1x8xf32>
    %61 = vector.broadcast %60 : vector<1x1x8xf32> to vector<8x8x8xf32>
    %62 = arith.mulf %58, %61 : vector<8x8x8xf32>
    %63 = arith.addf %57, %62 : vector<8x8x8xf32>
    %c2_47 = arith.constant 2 : index
    %c2_48 = arith.constant 2 : index
    %c0_49 = arith.constant 0 : index
    %64 = vector.load %arg26[%c2_47, %c2_48, %c0_49] : memref<10x10x8xf32, #tpu.memory_space<vmem>>, vector<8x8x8xf32>
    %c8 = arith.constant 8 : index
    %c0_50 = arith.constant 0 : index
    %65 = vector.load %arg4[%c8, %c0_50] : memref<9x8xf32, #tpu.memory_space<vmem>>, vector<1x8xf32>
    %66 = vector.shape_cast %65 : vector<1x8xf32> to vector<1x1x8xf32>
    %67 = vector.broadcast %66 : vector<1x1x8xf32> to vector<8x8x8xf32>
    %68 = arith.mulf %64, %67 : vector<8x8x8xf32>
    %69 = arith.addf %63, %68 : vector<8x8x8xf32>
    %70 = vector.shape_cast %69 : vector<8x8x8xf32> to vector<64x8xf32>
    %c0_51 = arith.constant 0 : index
    %c0_52 = arith.constant 0 : index
    %71 = vector.load %arg5[%c0_51, %c0_52] : memref<1x8xf32, #tpu.memory_space<vmem>>, vector<1x8xf32>
    %72 = vector.broadcast %71 : vector<1x8xf32> to vector<64x8xf32>
    %73 = arith.addf %70, %72 : vector<64x8xf32>
    %74 = arith.negf %73 : vector<64x8xf32>
    %75 = math.exp %74 : vector<64x8xf32>
    %cst_53 = arith.constant 1.000000e+00 : f32
    %76 = vector.broadcast %cst_53 : f32 to vector<64x8xf32>
    %77 = arith.addf %76, %75 : vector<64x8xf32>
    %78 = arith.divf %76, %77 : vector<64x8xf32>
    %79 = arith.mulf %73, %78 : vector<64x8xf32>
    %cst_54 = arith.constant dense<0.000000e+00> : vector<8xf32>
    %80 = vector.multi_reduction <add>, %79, %cst_54 [0] : vector<64x8xf32> to vector<8xf32>
    %81 = vector.shape_cast %80 : vector<8xf32> to vector<1x8xf32>
    %cst_55 = arith.constant 6.400000e+01 : f32
    %82 = vector.broadcast %cst_55 : f32 to vector<1x8xf32>
    %83 = arith.divf %81, %82 : vector<1x8xf32>
    %c0_56 = arith.constant 0 : index
    %c0_57 = arith.constant 0 : index
    %84 = vector.load %arg6[%c0_56, %c0_57] : memref<8x2xf32, #tpu.memory_space<vmem>>, vector<8x2xf32>
    %cst_58 = arith.constant dense<0.000000e+00> : vector<1x2xf32>
    %85 = tpu.matmul %83, %84, %cst_58 {dimension_numbers = #tpu.dot_dimension_numbers<[1], [0], [0], [1], [0, 0, 1, 1], [], []>} : vector<1x8xf32>, vector<8x2xf32>, vector<1x2xf32> -> vector<1x2xf32>
    %c0_59 = arith.constant 0 : index
    %c0_60 = arith.constant 0 : index
    %86 = vector.load %arg7[%c0_59, %c0_60] : memref<1x2xf32, #tpu.memory_space<vmem>>, vector<1x2xf32>
    %87 = arith.addf %85, %86 : vector<1x2xf32>
    %88 = arith.negf %87 : vector<1x2xf32>
    %89 = math.exp %88 : vector<1x2xf32>
    %cst_61 = arith.constant 1.000000e+00 : f32
    %90 = vector.broadcast %cst_61 : f32 to vector<1x2xf32>
    %91 = arith.addf %90, %89 : vector<1x2xf32>
    %92 = arith.divf %90, %91 : vector<1x2xf32>
    %93 = arith.mulf %87, %92 : vector<1x2xf32>
    %c0_62 = arith.constant 0 : index
    %c0_63 = arith.constant 0 : index
    %94 = vector.load %arg8[%c0_62, %c0_63] : memref<2x8xf32, #tpu.memory_space<vmem>>, vector<2x8xf32>
    %cst_64 = arith.constant dense<0.000000e+00> : vector<1x8xf32>
    %95 = tpu.matmul %93, %94, %cst_64 {dimension_numbers = #tpu.dot_dimension_numbers<[1], [0], [0], [1], [0, 0, 1, 1], [], []>} : vector<1x2xf32>, vector<2x8xf32>, vector<1x8xf32> -> vector<1x8xf32>
    %c0_65 = arith.constant 0 : index
    %c0_66 = arith.constant 0 : index
    %96 = vector.load %arg9[%c0_65, %c0_66] : memref<1x8xf32, #tpu.memory_space<vmem>>, vector<1x8xf32>
    %97 = arith.addf %95, %96 : vector<1x8xf32>
    %98 = arith.negf %97 : vector<1x8xf32>
    %99 = math.exp %98 : vector<1x8xf32>
    %cst_67 = arith.constant 1.000000e+00 : f32
    %100 = vector.broadcast %cst_67 : f32 to vector<1x8xf32>
    %101 = arith.addf %100, %99 : vector<1x8xf32>
    %102 = arith.divf %100, %101 : vector<1x8xf32>
    %103 = vector.broadcast %102 : vector<1x8xf32> to vector<64x8xf32>
    %104 = arith.mulf %79, %103 : vector<64x8xf32>
    %c0_68 = arith.constant 0 : index
    %c0_69 = arith.constant 0 : index
    %105 = vector.load %arg10[%c0_68, %c0_69] : memref<8x8xf32, #tpu.memory_space<vmem>>, vector<8x8xf32>
    %cst_70 = arith.constant dense<0.000000e+00> : vector<64x8xf32>
    %106 = tpu.matmul %104, %105, %cst_70 {dimension_numbers = #tpu.dot_dimension_numbers<[1], [0], [0], [1], [0, 0, 1, 1], [], []>} : vector<64x8xf32>, vector<8x8xf32>, vector<64x8xf32> -> vector<64x8xf32>
    %c0_71 = arith.constant 0 : index
    %c0_72 = arith.constant 0 : index
    %107 = vector.load %arg11[%c0_71, %c0_72] : memref<1x8xf32, #tpu.memory_space<vmem>>, vector<1x8xf32>
    %108 = vector.broadcast %107 : vector<1x8xf32> to vector<64x8xf32>
    %109 = arith.addf %106, %108 : vector<64x8xf32>
    %110 = arith.addf %109, %12 : vector<64x8xf32>
    %c0_73 = arith.constant 0 : index
    %c0_74 = arith.constant 0 : index
    %111 = vector.load %arg12[%c0_73, %c0_74] : memref<8x48xf32, #tpu.memory_space<vmem>>, vector<8x48xf32>
    %cst_75 = arith.constant dense<0.000000e+00> : vector<64x48xf32>
    %112 = tpu.matmul %110, %111, %cst_75 {dimension_numbers = #tpu.dot_dimension_numbers<[1], [0], [0], [1], [0, 0, 1, 1], [], []>} : vector<64x8xf32>, vector<8x48xf32>, vector<64x48xf32> -> vector<64x48xf32>
    %c0_76 = arith.constant 0 : index
    %c0_77 = arith.constant 0 : index
    %113 = vector.load %arg13[%c0_76, %c0_77] : memref<1x48xf32, #tpu.memory_space<vmem>>, vector<1x48xf32>
    %114 = vector.broadcast %113 : vector<1x48xf32> to vector<64x48xf32>
    %115 = arith.addf %112, %114 : vector<64x48xf32>
    %116 = arith.negf %115 : vector<64x48xf32>
    %117 = math.exp %116 : vector<64x48xf32>
    %cst_78 = arith.constant 1.000000e+00 : f32
    %118 = vector.broadcast %cst_78 : f32 to vector<64x48xf32>
    %119 = arith.addf %118, %117 : vector<64x48xf32>
    %120 = arith.divf %118, %119 : vector<64x48xf32>
    %121 = arith.mulf %115, %120 : vector<64x48xf32>
    %cst_79 = arith.constant 0.000000e+00 : f32
    %122 = vector.broadcast %cst_79 : f32 to vector<10x10x48xf32>
    %c0_80 = arith.constant 0 : index
    %c0_81 = arith.constant 0 : index
    %c0_82 = arith.constant 0 : index
    %123 = vector.load %arg27[%c0_80, %c0_81, %c0_82] : memref<10x10x48xf32, #tpu.memory_space<vmem>>, vector<10x10x48xf32>
    tpu.vector_store %arg27[%c0_80, %c0_81, %c0_82], %122 {strides = array<i32>} : memref<10x10x48xf32, #tpu.memory_space<vmem>>, vector<10x10x48xf32>,
    %124 = vector.shape_cast %121 : vector<64x48xf32> to vector<8x8x48xf32>
    %c1_83 = arith.constant 1 : index
    %c1_84 = arith.constant 1 : index
    %c0_85 = arith.constant 0 : index
    %125 = vector.load %arg27[%c1_83, %c1_84, %c0_85] : memref<10x10x48xf32, #tpu.memory_space<vmem>>, vector<8x8x48xf32>
    tpu.vector_store %arg27[%c1_83, %c1_84, %c0_85], %124 {strides = array<i32>} : memref<10x10x48xf32, #tpu.memory_space<vmem>>, vector<8x8x48xf32>,
    %c0_86 = arith.constant 0 : index
    %c0_87 = arith.constant 0 : index
    %c0_88 = arith.constant 0 : index
    %126 = vector.load %arg27[%c0_86, %c0_87, %c0_88] : memref<10x10x48xf32, #tpu.memory_space<vmem>>, vector<8x8x48xf32>
    %c0_89 = arith.constant 0 : index
    %c0_90 = arith.constant 0 : index
    %127 = vector.load %arg14[%c0_89, %c0_90] : memref<9x48xf32, #tpu.memory_space<vmem>>, vector<1x48xf32>
    %128 = vector.shape_cast %127 : vector<1x48xf32> to vector<1x1x48xf32>
    %129 = vector.broadcast %128 : vector<1x1x48xf32> to vector<8x8x48xf32>
    %130 = arith.mulf %126, %129 : vector<8x8x48xf32>
    %c0_91 = arith.constant 0 : index
    %c1_92 = arith.constant 1 : index
    %c0_93 = arith.constant 0 : index
    %131 = vector.load %arg27[%c0_91, %c1_92, %c0_93] : memref<10x10x48xf32, #tpu.memory_space<vmem>>, vector<8x8x48xf32>
    %c1_94 = arith.constant 1 : index
    %c0_95 = arith.constant 0 : index
    %132 = vector.load %arg14[%c1_94, %c0_95] : memref<9x48xf32, #tpu.memory_space<vmem>>, vector<1x48xf32>
    %133 = vector.shape_cast %132 : vector<1x48xf32> to vector<1x1x48xf32>
    %134 = vector.broadcast %133 : vector<1x1x48xf32> to vector<8x8x48xf32>
    %135 = arith.mulf %131, %134 : vector<8x8x48xf32>
    %136 = arith.addf %130, %135 : vector<8x8x48xf32>
    %c0_96 = arith.constant 0 : index
    %c2_97 = arith.constant 2 : index
    %c0_98 = arith.constant 0 : index
    %137 = vector.load %arg27[%c0_96, %c2_97, %c0_98] : memref<10x10x48xf32, #tpu.memory_space<vmem>>, vector<8x8x48xf32>
    %c2_99 = arith.constant 2 : index
    %c0_100 = arith.constant 0 : index
    %138 = vector.load %arg14[%c2_99, %c0_100] : memref<9x48xf32, #tpu.memory_space<vmem>>, vector<1x48xf32>
    %139 = vector.shape_cast %138 : vector<1x48xf32> to vector<1x1x48xf32>
    %140 = vector.broadcast %139 : vector<1x1x48xf32> to vector<8x8x48xf32>
    %141 = arith.mulf %137, %140 : vector<8x8x48xf32>
    %142 = arith.addf %136, %141 : vector<8x8x48xf32>
    %c1_101 = arith.constant 1 : index
    %c0_102 = arith.constant 0 : index
    %c0_103 = arith.constant 0 : index
    %143 = vector.load %arg27[%c1_101, %c0_102, %c0_103] : memref<10x10x48xf32, #tpu.memory_space<vmem>>, vector<8x8x48xf32>
    %c3_104 = arith.constant 3 : index
    %c0_105 = arith.constant 0 : index
    %144 = vector.load %arg14[%c3_104, %c0_105] : memref<9x48xf32, #tpu.memory_space<vmem>>, vector<1x48xf32>
    %145 = vector.shape_cast %144 : vector<1x48xf32> to vector<1x1x48xf32>
    %146 = vector.broadcast %145 : vector<1x1x48xf32> to vector<8x8x48xf32>
    %147 = arith.mulf %143, %146 : vector<8x8x48xf32>
    %148 = arith.addf %142, %147 : vector<8x8x48xf32>
    %c1_106 = arith.constant 1 : index
    %c1_107 = arith.constant 1 : index
    %c0_108 = arith.constant 0 : index
    %149 = vector.load %arg27[%c1_106, %c1_107, %c0_108] : memref<10x10x48xf32, #tpu.memory_space<vmem>>, vector<8x8x48xf32>
    %c4_109 = arith.constant 4 : index
    %c0_110 = arith.constant 0 : index
    %150 = vector.load %arg14[%c4_109, %c0_110] : memref<9x48xf32, #tpu.memory_space<vmem>>, vector<1x48xf32>
    %151 = vector.shape_cast %150 : vector<1x48xf32> to vector<1x1x48xf32>
    %152 = vector.broadcast %151 : vector<1x1x48xf32> to vector<8x8x48xf32>
    %153 = arith.mulf %149, %152 : vector<8x8x48xf32>
    %154 = arith.addf %148, %153 : vector<8x8x48xf32>
    %c1_111 = arith.constant 1 : index
    %c2_112 = arith.constant 2 : index
    %c0_113 = arith.constant 0 : index
    %155 = vector.load %arg27[%c1_111, %c2_112, %c0_113] : memref<10x10x48xf32, #tpu.memory_space<vmem>>, vector<8x8x48xf32>
    %c5_114 = arith.constant 5 : index
    %c0_115 = arith.constant 0 : index
    %156 = vector.load %arg14[%c5_114, %c0_115] : memref<9x48xf32, #tpu.memory_space<vmem>>, vector<1x48xf32>
    %157 = vector.shape_cast %156 : vector<1x48xf32> to vector<1x1x48xf32>
    %158 = vector.broadcast %157 : vector<1x1x48xf32> to vector<8x8x48xf32>
    %159 = arith.mulf %155, %158 : vector<8x8x48xf32>
    %160 = arith.addf %154, %159 : vector<8x8x48xf32>
    %c2_116 = arith.constant 2 : index
    %c0_117 = arith.constant 0 : index
    %c0_118 = arith.constant 0 : index
    %161 = vector.load %arg27[%c2_116, %c0_117, %c0_118] : memref<10x10x48xf32, #tpu.memory_space<vmem>>, vector<8x8x48xf32>
    %c6_119 = arith.constant 6 : index
    %c0_120 = arith.constant 0 : index
    %162 = vector.load %arg14[%c6_119, %c0_120] : memref<9x48xf32, #tpu.memory_space<vmem>>, vector<1x48xf32>
    %163 = vector.shape_cast %162 : vector<1x48xf32> to vector<1x1x48xf32>
    %164 = vector.broadcast %163 : vector<1x1x48xf32> to vector<8x8x48xf32>
    %165 = arith.mulf %161, %164 : vector<8x8x48xf32>
    %166 = arith.addf %160, %165 : vector<8x8x48xf32>
    %c2_121 = arith.constant 2 : index
    %c1_122 = arith.constant 1 : index
    %c0_123 = arith.constant 0 : index
    %167 = vector.load %arg27[%c2_121, %c1_122, %c0_123] : memref<10x10x48xf32, #tpu.memory_space<vmem>>, vector<8x8x48xf32>
    %c7_124 = arith.constant 7 : index
    %c0_125 = arith.constant 0 : index
    %168 = vector.load %arg14[%c7_124, %c0_125] : memref<9x48xf32, #tpu.memory_space<vmem>>, vector<1x48xf32>
    %169 = vector.shape_cast %168 : vector<1x48xf32> to vector<1x1x48xf32>
    %170 = vector.broadcast %169 : vector<1x1x48xf32> to vector<8x8x48xf32>
    %171 = arith.mulf %167, %170 : vector<8x8x48xf32>
    %172 = arith.addf %166, %171 : vector<8x8x48xf32>
    %c2_126 = arith.constant 2 : index
    %c2_127 = arith.constant 2 : index
    %c0_128 = arith.constant 0 : index
    %173 = vector.load %arg27[%c2_126, %c2_127, %c0_128] : memref<10x10x48xf32, #tpu.memory_space<vmem>>, vector<8x8x48xf32>
    %c8_129 = arith.constant 8 : index
    %c0_130 = arith.constant 0 : index
    %174 = vector.load %arg14[%c8_129, %c0_130] : memref<9x48xf32, #tpu.memory_space<vmem>>, vector<1x48xf32>
    %175 = vector.shape_cast %174 : vector<1x48xf32> to vector<1x1x48xf32>
    %176 = vector.broadcast %175 : vector<1x1x48xf32> to vector<8x8x48xf32>
    %177 = arith.mulf %173, %176 : vector<8x8x48xf32>
    %178 = arith.addf %172, %177 : vector<8x8x48xf32>
    %179 = vector.shape_cast %178 : vector<8x8x48xf32> to vector<64x48xf32>
    %c0_131 = arith.constant 0 : index
    %c0_132 = arith.constant 0 : index
    %180 = vector.load %arg16[%c0_131, %c0_132] : memref<16x64xf32, #tpu.memory_space<vmem>>, vector<16x64xf32>
    %cst_133 = arith.constant dense<0.000000e+00> : vector<16x48xf32>
    %181 = tpu.matmul %180, %179, %cst_133 {dimension_numbers = #tpu.dot_dimension_numbers<[1], [0], [0], [1], [0, 0, 1, 1], [], []>} : vector<16x64xf32>, vector<64x48xf32>, vector<16x48xf32> -> vector<16x48xf32>
    %c0_134 = arith.constant 0 : index
    %c0_135 = arith.constant 0 : index
    %182 = vector.load %arg15[%c0_134, %c0_135] : memref<1x48xf32, #tpu.memory_space<vmem>>, vector<1x48xf32>
    %183 = vector.broadcast %182 : vector<1x48xf32> to vector<16x48xf32>
    %184 = arith.addf %181, %183 : vector<16x48xf32>
    %185 = arith.negf %184 : vector<16x48xf32>
    %186 = math.exp %185 : vector<16x48xf32>
    %cst_136 = arith.constant 1.000000e+00 : f32
    %187 = vector.broadcast %cst_136 : f32 to vector<16x48xf32>
    %188 = arith.addf %187, %186 : vector<16x48xf32>
    %189 = arith.divf %187, %188 : vector<16x48xf32>
    %190 = arith.mulf %184, %189 : vector<16x48xf32>
    %cst_137 = arith.constant dense<0.000000e+00> : vector<48xf32>
    %191 = vector.multi_reduction <add>, %190, %cst_137 [0] : vector<16x48xf32> to vector<48xf32>
    %192 = vector.shape_cast %191 : vector<48xf32> to vector<1x48xf32>
    %cst_138 = arith.constant 1.600000e+01 : f32
    %193 = vector.broadcast %cst_138 : f32 to vector<1x48xf32>
    %194 = arith.divf %192, %193 : vector<1x48xf32>
    %c0_139 = arith.constant 0 : index
    %c0_140 = arith.constant 0 : index
    %195 = vector.load %arg17[%c0_139, %c0_140] : memref<48x2xf32, #tpu.memory_space<vmem>>, vector<48x2xf32>
    %cst_141 = arith.constant dense<0.000000e+00> : vector<1x2xf32>
    %196 = tpu.matmul %194, %195, %cst_141 {dimension_numbers = #tpu.dot_dimension_numbers<[1], [0], [0], [1], [0, 0, 1, 1], [], []>} : vector<1x48xf32>, vector<48x2xf32>, vector<1x2xf32> -> vector<1x2xf32>
    %c0_142 = arith.constant 0 : index
    %c0_143 = arith.constant 0 : index
    %197 = vector.load %arg18[%c0_142, %c0_143] : memref<1x2xf32, #tpu.memory_space<vmem>>, vector<1x2xf32>
    %198 = arith.addf %196, %197 : vector<1x2xf32>
    %199 = arith.negf %198 : vector<1x2xf32>
    %200 = math.exp %199 : vector<1x2xf32>
    %cst_144 = arith.constant 1.000000e+00 : f32
    %201 = vector.broadcast %cst_144 : f32 to vector<1x2xf32>
    %202 = arith.addf %201, %200 : vector<1x2xf32>
    %203 = arith.divf %201, %202 : vector<1x2xf32>
    %204 = arith.mulf %198, %203 : vector<1x2xf32>
    %c0_145 = arith.constant 0 : index
    %c0_146 = arith.constant 0 : index
    %205 = vector.load %arg19[%c0_145, %c0_146] : memref<2x48xf32, #tpu.memory_space<vmem>>, vector<2x48xf32>
    %cst_147 = arith.constant dense<0.000000e+00> : vector<1x48xf32>
    %206 = tpu.matmul %204, %205, %cst_147 {dimension_numbers = #tpu.dot_dimension_numbers<[1], [0], [0], [1], [0, 0, 1, 1], [], []>} : vector<1x2xf32>, vector<2x48xf32>, vector<1x48xf32> -> vector<1x48xf32>
    %c0_148 = arith.constant 0 : index
    %c0_149 = arith.constant 0 : index
    %207 = vector.load %arg20[%c0_148, %c0_149] : memref<1x48xf32, #tpu.memory_space<vmem>>, vector<1x48xf32>
    %208 = arith.addf %206, %207 : vector<1x48xf32>
    %209 = arith.negf %208 : vector<1x48xf32>
    %210 = math.exp %209 : vector<1x48xf32>
    %cst_150 = arith.constant 1.000000e+00 : f32
    %211 = vector.broadcast %cst_150 : f32 to vector<1x48xf32>
    %212 = arith.addf %211, %210 : vector<1x48xf32>
    %213 = arith.divf %211, %212 : vector<1x48xf32>
    %214 = vector.broadcast %213 : vector<1x48xf32> to vector<16x48xf32>
    %215 = arith.mulf %190, %214 : vector<16x48xf32>
    %c0_151 = arith.constant 0 : index
    %c0_152 = arith.constant 0 : index
    %216 = vector.load %arg21[%c0_151, %c0_152] : memref<48x128xf32, #tpu.memory_space<vmem>>, vector<48x128xf32>
    %cst_153 = arith.constant dense<0.000000e+00> : vector<16x128xf32>
    %217 = tpu.matmul %215, %216, %cst_153 {dimension_numbers = #tpu.dot_dimension_numbers<[1], [0], [0], [1], [0, 0, 1, 1], [], []>} : vector<16x48xf32>, vector<48x128xf32>, vector<16x128xf32> -> vector<16x128xf32>
    %c0_154 = arith.constant 0 : index
    %c0_155 = arith.constant 0 : index
    %218 = vector.load %arg22[%c0_154, %c0_155] : memref<1x128xf32, #tpu.memory_space<vmem>>, vector<1x128xf32>
    %219 = vector.broadcast %218 : vector<1x128xf32> to vector<16x128xf32>
    %220 = arith.addf %217, %219 : vector<16x128xf32>
    %221 = arith.negf %220 : vector<16x128xf32>
    %222 = math.exp %221 : vector<16x128xf32>
    %cst_156 = arith.constant 1.000000e+00 : f32
    %223 = vector.broadcast %cst_156 : f32 to vector<16x128xf32>
    %224 = arith.addf %223, %222 : vector<16x128xf32>
    %225 = arith.divf %223, %224 : vector<16x128xf32>
    %226 = arith.mulf %220, %225 : vector<16x128xf32>
    %cst_157 = arith.constant dense<0.000000e+00> : vector<128xf32>
    %227 = vector.multi_reduction <add>, %226, %cst_157 [0] : vector<16x128xf32> to vector<128xf32>
    %228 = vector.shape_cast %227 : vector<128xf32> to vector<1x128xf32>
    %cst_158 = arith.constant 1.600000e+01 : f32
    %229 = vector.broadcast %cst_158 : f32 to vector<1x128xf32>
    %230 = arith.divf %228, %229 : vector<1x128xf32>
    %c0_159 = arith.constant 0 : index
    %c0_160 = arith.constant 0 : index
    %231 = vector.load %arg23[%c0_159, %c0_160] : memref<128x1xf32, #tpu.memory_space<vmem>>, vector<128x1xf32>
    %cst_161 = arith.constant dense<0.000000e+00> : vector<1x1xf32>
    %232 = tpu.matmul %230, %231, %cst_161 {dimension_numbers = #tpu.dot_dimension_numbers<[1], [0], [0], [1], [0, 0, 1, 1], [], []>} : vector<1x128xf32>, vector<128x1xf32>, vector<1x1xf32> -> vector<1x1xf32>
    %c0_162 = arith.constant 0 : index
    %c0_163 = arith.constant 0 : index
    %233 = vector.load %arg24[%c0_162, %c0_163] : memref<1x1xf32, #tpu.memory_space<vmem>>, vector<1x1xf32>
    %234 = arith.addf %232, %233 : vector<1x1xf32>
    %c0_164 = arith.constant 0 : index
    %c0_165 = arith.constant 0 : index
    %c0_166 = arith.constant 0 : index
    %235 = vector.load %arg25[%c0_164, %c0_165, %c0_166] : memref<1x1x1xf32, #tpu.memory_space<vmem>>, vector<1x1x1xf32>
    %236 = vector.shape_cast %235 : vector<1x1x1xf32> to vector<1x1xf32>
    %237 = vector.shape_cast %234 : vector<1x1xf32> to vector<1x1x1xf32>
    tpu.vector_store %arg25[%c0_164, %c0_165, %c0_166], %237 {strides = array<i32>} : memref<1x1x1xf32, #tpu.memory_space<vmem>>, vector<1x1x1xf32>,
    return
  }
  func.func @transform_0(%arg0: i32) -> (i32, i32, i32) {
    %c0_i32 = arith.constant 0 : i32
    %c0_i32_0 = arith.constant 0 : i32
    %c0_i32_1 = arith.constant 0 : i32
    return %arg0, %c0_i32, %c0_i32_0 : i32, i32, i32
  }
  func.func @transform_1(%arg0: i32) -> (i32, i32) {
    %c0_i32 = arith.constant 0 : i32
    %c0_i32_0 = arith.constant 0 : i32
    %c0_i32_1 = arith.constant 0 : i32
    return %c0_i32, %c0_i32_0 : i32, i32
  }
  func.func @transform_2(%arg0: i32) -> (i32, i32) {
    %c0_i32 = arith.constant 0 : i32
    %c0_i32_0 = arith.constant 0 : i32
    %c0_i32_1 = arith.constant 0 : i32
    return %c0_i32, %c0_i32_0 : i32, i32
  }
  func.func @transform_3(%arg0: i32) -> (i32, i32) {
    %c0_i32 = arith.constant 0 : i32
    %c0_i32_0 = arith.constant 0 : i32
    %c0_i32_1 = arith.constant 0 : i32
    return %c0_i32, %c0_i32_0 : i32, i32
  }
  func.func @transform_4(%arg0: i32) -> (i32, i32) {
    %c0_i32 = arith.constant 0 : i32
    %c0_i32_0 = arith.constant 0 : i32
    %c0_i32_1 = arith.constant 0 : i32
    return %c0_i32, %c0_i32_0 : i32, i32
  }
  func.func @transform_5(%arg0: i32) -> (i32, i32) {
    %c0_i32 = arith.constant 0 : i32
    %c0_i32_0 = arith.constant 0 : i32
    %c0_i32_1 = arith.constant 0 : i32
    return %c0_i32, %c0_i32_0 : i32, i32
  }
  func.func @transform_6(%arg0: i32) -> (i32, i32) {
    %c0_i32 = arith.constant 0 : i32
    %c0_i32_0 = arith.constant 0 : i32
    %c0_i32_1 = arith.constant 0 : i32
    return %c0_i32, %c0_i32_0 : i32, i32
  }
  func.func @transform_7(%arg0: i32) -> (i32, i32) {
    %c0_i32 = arith.constant 0 : i32
    %c0_i32_0 = arith.constant 0 : i32
    %c0_i32_1 = arith.constant 0 : i32
    return %c0_i32, %c0_i32_0 : i32, i32
  }
  func.func @transform_8(%arg0: i32) -> (i32, i32) {
    %c0_i32 = arith.constant 0 : i32
    %c0_i32_0 = arith.constant 0 : i32
    %c0_i32_1 = arith.constant 0 : i32
    return %c0_i32, %c0_i32_0 : i32, i32
  }
  func.func @transform_9(%arg0: i32) -> (i32, i32) {
    %c0_i32 = arith.constant 0 : i32
    %c0_i32_0 = arith.constant 0 : i32
    %c0_i32_1 = arith.constant 0 : i32
    return %c0_i32, %c0_i32_0 : i32, i32
  }
  func.func @transform_10(%arg0: i32) -> (i32, i32) {
    %c0_i32 = arith.constant 0 : i32
    %c0_i32_0 = arith.constant 0 : i32
    %c0_i32_1 = arith.constant 0 : i32
    return %c0_i32, %c0_i32_0 : i32, i32
  }
  func.func @transform_11(%arg0: i32) -> (i32, i32) {
    %c0_i32 = arith.constant 0 : i32
    %c0_i32_0 = arith.constant 0 : i32
    %c0_i32_1 = arith.constant 0 : i32
    return %c0_i32, %c0_i32_0 : i32, i32
  }
  func.func @transform_12(%arg0: i32) -> (i32, i32) {
    %c0_i32 = arith.constant 0 : i32
    %c0_i32_0 = arith.constant 0 : i32
    %c0_i32_1 = arith.constant 0 : i32
    return %c0_i32, %c0_i32_0 : i32, i32
  }
  func.func @transform_13(%arg0: i32) -> (i32, i32) {
    %c0_i32 = arith.constant 0 : i32
    %c0_i32_0 = arith.constant 0 : i32
    %c0_i32_1 = arith.constant 0 : i32
    return %c0_i32, %c0_i32_0 : i32, i32
  }
  func.func @transform_14(%arg0: i32) -> (i32, i32) {
    %c0_i32 = arith.constant 0 : i32
    %c0_i32_0 = arith.constant 0 : i32
    %c0_i32_1 = arith.constant 0 : i32
    return %c0_i32, %c0_i32_0 : i32, i32
  }
  func.func @transform_15(%arg0: i32) -> (i32, i32) {
    %c0_i32 = arith.constant 0 : i32
    %c0_i32_0 = arith.constant 0 : i32
    %c0_i32_1 = arith.constant 0 : i32
    return %c0_i32, %c0_i32_0 : i32, i32
  }
  func.func @transform_16(%arg0: i32) -> (i32, i32) {
    %c0_i32 = arith.constant 0 : i32
    %c0_i32_0 = arith.constant 0 : i32
    %c0_i32_1 = arith.constant 0 : i32
    return %c0_i32, %c0_i32_0 : i32, i32
  }
  func.func @transform_17(%arg0: i32) -> (i32, i32) {
    %c0_i32 = arith.constant 0 : i32
    %c0_i32_0 = arith.constant 0 : i32
    %c0_i32_1 = arith.constant 0 : i32
    return %c0_i32, %c0_i32_0 : i32, i32
  }
  func.func @transform_18(%arg0: i32) -> (i32, i32) {
    %c0_i32 = arith.constant 0 : i32
    %c0_i32_0 = arith.constant 0 : i32
    %c0_i32_1 = arith.constant 0 : i32
    return %c0_i32, %c0_i32_0 : i32, i32
  }
  func.func @transform_19(%arg0: i32) -> (i32, i32) {
    %c0_i32 = arith.constant 0 : i32
    %c0_i32_0 = arith.constant 0 : i32
    %c0_i32_1 = arith.constant 0 : i32
    return %c0_i32, %c0_i32_0 : i32, i32
  }
  func.func @transform_20(%arg0: i32) -> (i32, i32) {
    %c0_i32 = arith.constant 0 : i32
    %c0_i32_0 = arith.constant 0 : i32
    %c0_i32_1 = arith.constant 0 : i32
    return %c0_i32, %c0_i32_0 : i32, i32
  }
  func.func @transform_21(%arg0: i32) -> (i32, i32) {
    %c0_i32 = arith.constant 0 : i32
    %c0_i32_0 = arith.constant 0 : i32
    %c0_i32_1 = arith.constant 0 : i32
    return %c0_i32, %c0_i32_0 : i32, i32
  }
  func.func @transform_22(%arg0: i32) -> (i32, i32) {
    %c0_i32 = arith.constant 0 : i32
    %c0_i32_0 = arith.constant 0 : i32
    %c0_i32_1 = arith.constant 0 : i32
    return %c0_i32, %c0_i32_0 : i32, i32
  }
  func.func @transform_23(%arg0: i32) -> (i32, i32) {
    %c0_i32 = arith.constant 0 : i32
    %c0_i32_0 = arith.constant 0 : i32
    %c0_i32_1 = arith.constant 0 : i32
    return %c0_i32, %c0_i32_0 : i32, i32
  }
  func.func @transform_24(%arg0: i32) -> (i32, i32, i32) {
    %c0_i32 = arith.constant 0 : i32
    %c0_i32_0 = arith.constant 0 : i32
    %c0_i32_1 = arith.constant 0 : i32
    return %arg0, %c0_i32, %c0_i32_0 : i32, i32, i32
  }
}

</mosaic_0001>

<bundles_post_ra>
// kernel: tpu_custom_call.1
= control target key start
LH: loop header
LB: loop body
LE: loop exit
PB: predicated region body
PF: predicated region fallthrough
CT: control target
= control target key end

     0   :  { %s3349_s27 = smov 0   ;;  %s4137_s0 = inlined_call_operand.vmem [shape: f32[2,64,27], index: 0, kind: input, shape index: {}]   ;;  %s4138_s1 = inlined_call_operand.vmem [shape: f32[27,8], index: 1, kind: input, shape index: {}]   ;;  %s4139_s2 = inlined_call_operand.vmem [shape: f32[1,8], index: 2, kind: input, shape index: {}]   ;;  %s4140_s3 = inlined_call_operand.vmem [shape: f32[9,8], index: 3, kind: input, shape index: {}]   ;;  %s4141_s4 = inlined_call_operand.vmem [shape: f32[1,8], index: 4, kind: input, shape index: {}]   ;;  %s4142_s5 = inlined_call_operand.vmem [shape: f32[8,2], index: 5, kind: input, shape index: {}]   ;;  %s4143_s6 = inlined_call_operand.vmem [shape: f32[1,2], index: 6, kind: input, shape index: {}]   ;;  %s4144_s7 = inlined_call_operand.vmem [shape: f32[2,8], index: 7, kind: input, shape index: {}]   ;;  %s4145_s8 = inlined_call_operand.vmem [shape: f32[1,8], index: 8, kind: input, shape index: {}]   ;;  %s4146_s9 = inlined_call_operand.vmem [shape: f32[8,8], index: 9, kind: input, shape index: {}]   ;;  %s4147_s10 = inlined_call_operand.vmem [shape: f32[1,8], index: 10, kind: input, shape index: {}]   ;;  %s4148_s11 = inlined_call_operand.vmem [shape: f32[8,48], index: 11, kind: input, shape index: {}]   ;;  %s4149_s12 = inlined_call_operand.vmem [shape: f32[1,48], index: 12, kind: input, shape index: {}]   ;;  %s4150_s13 = inlined_call_operand.vmem [shape: f32[9,48], index: 13, kind: input, shape index: {}]   ;;  %s4151_s14 = inlined_call_operand.vmem [shape: f32[1,48], index: 14, kind: input, shape index: {}]   ;;  %s4152_s15 = inlined_call_operand.vmem [shape: f32[16,64], index: 15, kind: input, shape index: {}]   ;;  %s4153_s16 = inlined_call_operand.vmem [shape: f32[48,2], index: 16, kind: input, shape index: {}]   ;;  %s4154_s17 = inlined_call_operand.vmem [shape: f32[1,2], index: 17, kind: input, shape index: {}]   ;;  %s4155_s18 = inlined_call_operand.vmem [shape: f32[2,48], index: 18, kind: input, shape index: {}]   ;;  %s4156_s19 = inlined_call_operand.vmem [shape: f32[1,48], index: 19, kind: input, shape index: {}]   ;;  %s4157_s20 = inlined_call_operand.vmem [shape: f32[48,128], index: 20, kind: input, shape index: {}]   ;;  %s4158_s21 = inlined_call_operand.vmem [shape: f32[1,128], index: 21, kind: input, shape index: {}]   ;;  %s4159_s22 = inlined_call_operand.vmem [shape: f32[128,1], index: 22, kind: input, shape index: {}]   ;;  %s4160_s23 = inlined_call_operand.<no memory space> [shape: f32[1,1], index: 23, kind: input, shape index: {}]   ;;  %s4161_s24 = inlined_call_operand.vmem [shape: f32[2,1,1], index: 24, kind: output, shape index: {}]  }
   0x1   :  { %4172 = sst [smem:[#allocation11_spill]] %s4137_s0  ;;  %v29_v0 = vstv %s4160_s23 }
   0x2   :  { %4173 = sst [smem:[#allocation12_spill]] %s4138_s1  ;;  %30 = vst [vmem:[#allocation4] sm:$0x1] %v29_v0 }
   0x3   :  { %4174 = sst [smem:[#allocation13_spill]] %s4139_s2 }
   0x4   :  { %4175 = sst [smem:[#allocation14_spill]] %s4140_s3 }
   0x5   :  { %4176 = sst [smem:[#allocation15_spill]] %s4141_s4 }
   0x6   :  { %4177 = sst [smem:[#allocation16_spill]] %s4142_s5 }
   0x7   :  { %4178 = sst [smem:[#allocation17_spill]] %s4143_s6 }
   0x8   :  { %4179 = sst [smem:[#allocation18_spill]] %s4144_s7 }
   0x9   :  { %4180 = sst [smem:[#allocation19_spill]] %s4145_s8 }
   0xa LB: > { %s2672_s28 = sadd.s32 4294967295, %s3215_s27   ;;  %p2676_p0 = scmp.ge.s32.totalorder %s3215_s27, 1  ;;  %s3215_s27 = sphi %s3349_s27, %s36_s27  }
   0xb   : > { %p664_p1 = scmp.lt.s32.totalorder %s3215_s27, 3 }
   0xd   : > { %p665_p2 = pnand %p2676_p0, %p664_p1 }
   0xf   : > { %668 = sbr.rel (%p665_p2) target bundleno = 2605 (0xa2d), region = 116 }
  0x16   : > { %s4181_s29 = sld [smem:[#allocation12_spill]]  ;;  %vm780_vm0 = vcmask 1042432   ;;  %p728_p3 = scmp.lt.s32.totalorder %s2672_s28, 1  ;;  %vm3217_vm1 = vmmov 1   ;;  %vm755_vm3 = vcmask 220160   ;;  %vm945_vm4 = vcmask 64512  }
  0x17   : > { %vm3003_vm2 = vmpackc.low %vm780_vm0, %vm3217_vm1  ;;  %s4182_s5 = sld [smem:[#allocation11_spill]]  ;;  %vm947_vm5 = vcmask 58368   ;;  %v4164_v15 = vmov 0.0   ;;  %s4183_s23 = sld [smem:[#allocation16_spill]]  ;;  %vm3219_vm6 = vmmov 0   ;;  %vm1412_vm7 = vcmask 1041408  }
  0x18   : > { %s4204_s28 = smov (!%p728_p3, %s2672_s28), 1  ;;  %948 = vst.msk [vmem:[#allocation2 + $0x8] sm:$0x3] %vm947_vm5, %v4164_v15  ;;  %952 = vst.msk [vmem:[#allocation2 + $0x28] sm:$0x3] %vm947_vm5, %v4164_v15  ;;  %2871 = vmatprep.subr.mxu1 %v4164_v15  ;;  %2873 = vmatprep.mubr.msk.f32.mxu1 %vm3219_vm6, %v4164_v15  ;;  %s4184_s30 = sld [smem:[#allocation13_spill]] }
  0x19   : > { %s2772_s8 = sshll.u32 %s4204_s28, 6  ;;  %951 = vst.msk [vmem:[#allocation2 + $0x20] sm:$0xff] %vm945_vm4, %v4164_v15  ;;  %946 = vst.msk [vmem:[#allocation2] sm:$0xff] %vm945_vm4, %v4164_v15  ;;  %s4195_s4 = sld [smem:[#allocation17_spill]]  ;;  %vm1408_vm8 = vcmask 15360   ;;  %vm1842_vm9 = vcmask 392192  }
  0x1a   : > { %949 = vst.msk [vmem:[#allocation2 + $0x10] sm:$0xff] %vm945_vm4, %v4164_v15  ;;  %953 = vst.msk [vmem:[#allocation2 + $0x30] sm:$0xff] %vm945_vm4, %v4164_v15  ;;  %s4196_s0 = sld [smem:[#allocation19_spill]]  ;;  %vm1844_vm10 = vcmask 386048   ;;  %vm2136_vm11 = vcmask 523264   ;;  %vm2623_vm12 = vcmask 0  }
  0x1b   : > { %950 = vst.msk [vmem:[#allocation2 + $0x18] sm:$0x3] %vm947_vm5, %v4164_v15  ;;  %954 = vst.msk [vmem:[#allocation2 + $0x38] sm:$0x3] %vm947_vm5, %v4164_v15 }
  0x1c   : > { %v744_v1 = vld [vmem:[%s4181_s29] sm:$0xff]  ;;  %v745_v2 = vld [vmem:[%s4181_s29 + $0x8] sm:$0xff]  ;;  %v746_v3 = vld [vmem:[%s4181_s29 + $0x10] sm:$0xff]  ;;  %955 = vst.msk [vmem:[#allocation2 + $0x40] sm:$0xff] %vm945_vm4, %v4164_v15 }
  0x1d   : > { %v2998_v4 = vpack.c.bf16 %v745_v2, %v744_v1  ;;  %v747_v5 = vld [vmem:[%s4181_s29 + $0x18] sm:$0x7]  ;;  %s732_s26 = scalar_lea.vmem %s4182_s5, %s2772_s8  ;;  %956 = vst.msk [vmem:[#allocation2 + $0x48] sm:$0x3] %vm947_vm5, %v4164_v15  ;;  %958 = vst.msk [vmem:[#allocation2 + $0x58] sm:$0x3] %vm947_vm5, %v4164_v15 }
  0x1e   : > { %v3002_v6 = vpack.c.bf16 %v747_v5, %v746_v3  ;;  %v736_v7 = vld [vmem:[%s732_s26] sm:$0xff]  ;;  %v737_v8 = vld [vmem:[%s732_s26 + $0x8] sm:$0xff]  ;;  %v738_v9 = vld [vmem:[%s732_s26 + $0x10] sm:$0xff]  ;;  %957 = vst.msk [vmem:[#allocation2 + $0x50] sm:$0xff] %vm945_vm4, %v4164_v15  ;;  %s4185_s8 = sld [smem:[#allocation14_spill]] }
  0x1f   : > { %2999 = vmatprep.subr.bf16.mxu0 %v2998_v4  ;;  %2859 = vmatprep.mubr.msk.f32.mxu0 %vm755_vm3, %v736_v7  ;;  %v739_v10 = vld [vmem:[%s732_s26 + $0x18] sm:$0xff]  ;;  %v740_v11 = vld [vmem:[%s732_s26 + $0x20] sm:$0xff]  ;;  %v741_v12 = vld [vmem:[%s732_s26 + $0x28] sm:$0xff]  ;;  %959 = vst.msk [vmem:[#allocation2 + $0x60] sm:$0xff] %vm945_vm4, %v4164_v15 }
  0x20   : > { %3001 = vmatpush3.bf16.msra.mxu0 %v2998_v4  ;;  %v742_v13 = vld [vmem:[%s732_s26 + $0x30] sm:$0xff]  ;;  %v743_v14 = vld [vmem:[%s732_s26 + $0x38] sm:$0xff]  ;;  %960 = vst.msk [vmem:[#allocation2 + $0x68] sm:$0x3] %vm947_vm5, %v4164_v15  ;;  %962 = vst.msk [vmem:[#allocation2 + $0x78] sm:$0x3] %vm947_vm5, %v4164_v15 }
  0x21   : > { %3004 = vmatprep.subr.msk.bf16.mxu0 %vm3003_vm2, %v3002_v6  ;;  %961 = vst.msk [vmem:[#allocation2 + $0x70] sm:$0xff] %vm945_vm4, %v4164_v15  ;;  %963 = vst.msk [vmem:[#allocation2 + $0x80] sm:$0xff] %vm945_vm4, %v4164_v15  ;;  %v1324_v16 = vld [vmem:[%s4183_s23] sm:$0xff]  ;;  %s4192_s23 = sld [smem:[#allocation15_spill]] }
  0x22   : > { %964 = vst.msk [vmem:[#allocation2 + $0x88] sm:$0x3] %vm947_vm5, %v4164_v15  ;;  %966 = vst.msk [vmem:[#allocation2 + $0x98] sm:$0x3] %vm947_vm5, %v4164_v15  ;;  %2872 = vmatpush3.msra.mxu1 %v1324_v16  ;;  %v2679_v17 = vld [vmem:[%s4184_s30] ss:$0 sm:$0xff] }
  0x23   : > { %965 = vst.msk [vmem:[#allocation2 + $0x90] sm:$0xff] %vm945_vm4, %v4164_v15  ;;  %2876 = vmatprep.subr.mxu1 %v4164_v15  ;;  %v976_v56 = vld [vmem:[#allocation2] sm:$0xff]  ;;  %s4194_s30 = sld [smem:[#allocation18_spill]] }
  0x24   : > { %3007 = vmatpush3.bf16.msk.msra.mxu0 %vm3003_vm2, %v3002_v6  ;;  %v3454_v53 = vld [vmem:[%s4185_s8] ss:$0 sm:$0xff]  ;;  %v3459_v55 = vld [vmem:[%s4185_s8 + $0x1] ss:$0 sm:$0xff]  ;;  %v3468_v2 = vld [vmem:[%s4185_s8 + $0x2] ss:$0 sm:$0xff] }
  0x25   : > { %v997_v57 = vld [vmem:[#allocation2 + $0x1] sm:$0xff]  ;;  %v989_v63 = vmul.f32 %v3454_v53, %v976_v56 }
  0x26   : > { %v1010_v0 = vmul.f32 %v3459_v55, %v997_v57  ;;  %v1026_v4 = vld [vmem:[#allocation2 + $0x2] sm:$0xff] }
  0x27   : > { %2860 = vmatmul.mubr.msk.f32.vlgmr.msra.gmra.mrb[0].mxu0 %vm755_vm3, %v737_v8 }
  0x28   : > { %2862 = vmatprep.mubr.msk.f32.mxu0 %vm755_vm3, %v738_v9  ;;  %v1018_v9 = vadd.f32 %v1010_v0, %v989_v63 }
  0x2b   : > { %2863 = vmatmul.mubr.msk.f32.gmra.mrb[2].mxu0 %vm755_vm3, %v739_v10  ;;  %v1039_v10 = vmul.f32 %v3468_v2, %v1026_v4 }
  0x2c   : > { %2865 = vmatprep.mubr.msk.f32.mxu0 %vm755_vm3, %v740_v11 }
  0x2f   : > { %2866 = vmatmul.mubr.msk.f32.gmra.mrb[4].mxu0 %vm755_vm3, %v741_v12  ;;  %v1150_v12 = vld [vmem:[#allocation2 + $0x90] sm:$0xff] }
  0x30   : > { %2868 = vmatprep.mubr.msk.f32.mxu0 %vm755_vm3, %v742_v13  ;;  %v1179_v13 = vld [vmem:[#allocation2 + $0x91] sm:$0xff] }
  0x33   : > { %2869 = vmatmul.mubr.msk.f32.gmra.mrb[6].mxu0 %vm755_vm3, %v743_v14  ;;  %v1208_v14 = vld [vmem:[#allocation2 + $0x92] sm:$0xff] }
  0xfa   : > { %v2861_v18 = vpop.f32.mrb[0].mxu0 }
  0xfb   : > { %v856_v19 = vadd.f32 %v2861_v18, %v2679_v17  ;;  %v850_v20 = vpop.f32.mrb[1].mxu0  ;;  %v3495_v18 = vld [vmem:[%s4185_s8 + $0x4] ss:$0 sm:$0xff] }
  0xfc   : > { %v851_v21 = vadd.f32 %v2679_v17, %v850_v20 }
  0xfd   : > { %v2690_v22 = vmul.f32 -1.442695, %v856_v19 }
  0xfe   : > { %v2689_v23 = vmul.f32 -1.442695, %v851_v21  ;;  %v2864_v24 = vpop.f32.mrb[2].mxu0 }
  0xff   : > { %3081 = vpow2.f32 %v2690_v22  ;;  %v3433_v25 = vadd.f32 %v2864_v24, %v2679_v17  ;;  %v860_v26 = vpop.f32.mrb[3].mxu0  ;;  %v3503_v22 = vld [vmem:[%s4185_s8 + $0x5] ss:$0 sm:$0xff]  ;;  %v3513_v24 = vld [vmem:[%s4185_s8 + $0x7] ss:$0 sm:$0xff] }
 0x100   : > { %3083 = vpow2.f32 %v2689_v23  ;;  %v3435_v27 = vadd.f32 %v2679_v17, %v860_v26  ;;  %v3508_v23 = vld [vmem:[%s4185_s8 + $0x6] ss:$0 sm:$0xff] }
 0x101   : > { %v2692_v28 = vmul.f32 -1.442695, %v3433_v25 }
 0x102   : > { %v2691_v29 = vmul.f32 -1.442695, %v3435_v27  ;;  %v2867_v30 = vpop.f32.mrb[4].mxu0 }
 0x103   : > { %3085 = vpow2.f32 %v2692_v28  ;;  %v3439_v31 = vadd.f32 %v2867_v30, %v2679_v17  ;;  %v870_v32 = vpop.f32.mrb[5].mxu0  ;;  %v3530_v30 = vmul.f32 %v3508_v23, %v1150_v12 }
 0x104   : > { %3087 = vpow2.f32 %v2691_v29  ;;  %v3441_v33 = vadd.f32 %v2679_v17, %v870_v32 }
 0x105   : > { %v2694_v34 = vmul.f32 -1.442695, %v3439_v31 }
 0x106   : > { %v2693_v35 = vmul.f32 -1.442695, %v3441_v33  ;;  %v2870_v36 = vpop.f32.mrb[6].mxu0 }
 0x107   : > { %3089 = vpow2.f32 %v2694_v34  ;;  %v3445_v37 = vadd.f32 %v2870_v36, %v2679_v17  ;;  %v880_v38 = vpop.f32.mrb[7].mxu0 }
 0x108   : > { %3091 = vpow2.f32 %v2693_v35  ;;  %v3447_v39 = vadd.f32 %v2679_v17, %v880_v38  ;;  %v3488_v17 = vld [vmem:[%s4185_s8 + $0x3] ss:$0 sm:$0xff] }
 0x109   : > { %v3082_v40 = vpop.eup %3081  ;;  %v2696_v41 = vmul.f32 -1.442695, %v3445_v37 }
 0x10a   : > { %v3084_v42 = vpop.eup %3083  ;;  %v914_v43 = vadd.f32 1.0, %v3082_v40  ;;  %v2695_v44 = vmul.f32 -1.442695, %v3447_v39 }
 0x10b   : > { %v913_v45 = vadd.f32 1.0, %v3084_v42  ;;  %3093 = vpow2.f32 %v2696_v41 }
 0x10c   : > { %3095 = vrcp.f32 %v914_v43 }
 0x10d   : > { %v3086_v46 = vpop.eup %3085  ;;  %3097 = vrcp.f32 %v913_v45 }
 0x10e   : > { %v3088_v47 = vpop.eup %3087  ;;  %v916_v48 = vadd.f32 1.0, %v3086_v46  ;;  %3099 = vpow2.f32 %v2695_v44 }
 0x10f   : > { %v915_v49 = vadd.f32 1.0, %v3088_v47 }
 0x110   : > { %3101 = vrcp.f32 %v916_v48 }
 0x111   : > { %v3090_v50 = vpop.eup %3089  ;;  %3103 = vrcp.f32 %v915_v49 }
 0x112   : > { %v3092_v51 = vpop.eup %3091  ;;  %v918_v52 = vadd.f32 1.0, %v3090_v50 }
 0x113   : > { %v917_v54 = vadd.f32 1.0, %v3092_v51 }
 0x114   : > { %3105 = vrcp.f32 %v918_v52 }
 0x115   : > { %v3094_v58 = vpop.eup %3093  ;;  %3107 = vrcp.f32 %v917_v54 }
 0x116   : > { %v3096_v59 = vpop.eup %3095  ;;  %v920_v60 = vadd.f32 1.0, %v3094_v58 }
 0x117   : > { %v3098_v61 = vpop.eup %3097  ;;  %v3461_v62 = vmul.f32 %v3096_v59, %v856_v19 }
 0x118   : > { %v3100_v1 = vpop.eup %3099  ;;  %v3470_v3 = vmul.f32 %v3098_v61, %v851_v21  ;;  %3109 = vrcp.f32 %v920_v60  ;;  %v1047_v21 = vadd.f32 %v1039_v10, %v1018_v9 }
 0x119   : > { %969 = vst.msk [vmem:[#allocation2 + $0x21] sm:$0xff] %vm945_vm4, %v3461_v62  ;;  %v919_v5 = vadd.f32 1.0, %v3100_v1 }
 0x11a   : > { %v3102_v6 = vpop.eup %3101  ;;  %968 = vst.msk [vmem:[#allocation2 + $0x11] sm:$0xff] %vm945_vm4, %v3470_v3 }
 0x11b   : > { %v3104_v7 = vpop.eup %3103  ;;  %v3477_v8 = vmul.f32 %v3102_v6, %v3433_v25  ;;  %3111 = vrcp.f32 %v919_v5  ;;  %v3518_v25 = vld [vmem:[%s4185_s8 + $0x8] ss:$0 sm:$0xff] }
 0x11c   : > { %v3481_v11 = vmul.f32 %v3104_v7, %v3435_v27  ;;  %v3536_v32 = vmul.f32 %v3518_v25, %v1208_v14 }
 0x11d   : > { %4186 = vst [vmem:[#allocation5_spill] sm:$0xff] %v3477_v8  ;;  %971 = vst.msk [vmem:[#allocation2 + $0x41] sm:$0xff] %vm945_vm4, %v3477_v8 }
 0x11e   : > { %4187 = vst [vmem:[#allocation6_spill] sm:$0xff] %v3481_v11  ;;  %v3106_v16 = vpop.eup %3105  ;;  %970 = vst.msk [vmem:[#allocation2 + $0x31] sm:$0xff] %vm945_vm4, %v3481_v11 }
 0x11f   : > { %v3108_v19 = vpop.eup %3107  ;;  %v3498_v20 = vmul.f32 %v3106_v16, %v3439_v31  ;;  %v3533_v31 = vmul.f32 %v3513_v24, %v1179_v13 }
 0x120   : > { %v3520_v26 = vld [vmem:[#allocation2 + $0x20] sm:$0xff]  ;;  %v3527_v29 = vmul.f32 %v3108_v19, %v3441_v33 }
 0x121   : > { %4188 = vst [vmem:[#allocation7_spill] sm:$0xff] %v3498_v20  ;;  %v3522_v27 = vld [vmem:[#allocation2 + $0x21] sm:$0xff]  ;;  %v991_v34 = vmul.f32 %v3454_v53, %v3520_v26  ;;  %v1069_v33 = vmul.f32 %v3488_v17, %v3520_v26  ;;  %v977_v38 = vld [vmem:[#allocation2 + $0x10] sm:$0xff]  ;;  %973 = vst.msk [vmem:[#allocation2 + $0x61] sm:$0xff] %vm945_vm4, %v3498_v20 }
 0x122   : > { %v3524_v28 = vld [vmem:[#allocation2 + $0x22] sm:$0xff]  ;;  %4189 = vst [vmem:[#allocation8_spill] sm:$0xff] %v3527_v29  ;;  %v1012_v35 = vmul.f32 %v3459_v55, %v3522_v27  ;;  %v998_v40 = vld [vmem:[#allocation2 + $0x11] sm:$0xff]  ;;  %v3110_v42 = vpop.eup %3109  ;;  %v990_v43 = vmul.f32 %v3454_v53, %v977_v38  ;;  %v1068_v46 = vmul.f32 %v3488_v17, %v977_v38  ;;  %972 = vst.msk [vmem:[#allocation2 + $0x51] sm:$0xff] %vm945_vm4, %v3527_v29 }
 0x123   : > { %v1041_v36 = vmul.f32 %v3468_v2, %v3524_v28  ;;  %v1027_v41 = vld [vmem:[#allocation2 + $0x12] sm:$0xff]  ;;  %v1011_v44 = vmul.f32 %v3459_v55, %v998_v40  ;;  %v3555_v47 = vmul.f32 %v3110_v42, %v3445_v37  ;;  %v1097_v49 = vmul.f32 %v3495_v18, %v998_v40 }
 0x124   : > { %v1040_v45 = vmul.f32 %v3468_v2, %v1027_v41  ;;  %v1020_v48 = vadd.f32 %v1012_v35, %v991_v34  ;;  %v1098_v50 = vmul.f32 %v3495_v18, %v3522_v27  ;;  %v3560_v52 = vld [vmem:[#allocation2 + $0x40] sm:$0xff]  ;;  %v1076_v57 = vadd.f32 %v1068_v46, %v1047_v21 }
 0x125   : > { %4190 = vst [vmem:[#allocation9_spill] sm:$0xff] %v3555_v47  ;;  %v1019_v51 = vadd.f32 %v1011_v44, %v990_v43  ;;  %v3562_v54 = vld [vmem:[#allocation2 + $0x41] sm:$0xff]  ;;  %v3567_v58 = vmul.f32 %v3503_v22, %v1027_v41  ;;  %v3571_v37 = vmul.f32 %v3503_v22, %v3524_v28  ;;  %v3112_v59 = vpop.eup %3111  ;;  %v3573_v60 = vld [vmem:[#allocation2 + $0x30] sm:$0xff]  ;;  %975 = vst.msk [vmem:[#allocation2 + $0x81] sm:$0xff] %vm945_vm4, %v3555_v47 }
 0x126   : > { %v3564_v56 = vld [vmem:[#allocation2 + $0x42] sm:$0xff]  ;;  %v3575_v61 = vld [vmem:[#allocation2 + $0x31] sm:$0xff]  ;;  %v993_v0 = vmul.f32 %v3454_v53, %v3560_v52  ;;  %v1014_v1 = vmul.f32 %v3459_v55, %v3562_v54  ;;  %v1049_v5 = vadd.f32 %v1041_v36, %v1020_v48  ;;  %v992_v6 = vmul.f32 %v3454_v53, %v3573_v60 }
 0x127   : > { %v3577_v63 = vld [vmem:[#allocation2 + $0x32] sm:$0xff]  ;;  %v1043_v4 = vmul.f32 %v3468_v2, %v3564_v56  ;;  %v1013_v7 = vmul.f32 %v3459_v55, %v3575_v61  ;;  %v3592_v9 = vmul.f32 %v3112_v59, %v3447_v39  ;;  %v1048_v13 = vadd.f32 %v1040_v45, %v1019_v51 }
 0x128   : > { %v1042_v10 = vmul.f32 %v3468_v2, %v3577_v63  ;;  %v1022_v12 = vadd.f32 %v1014_v1, %v993_v0  ;;  %v1070_v14 = vmul.f32 %v3488_v17, %v3573_v60  ;;  %v1071_v16 = vmul.f32 %v3488_v17, %v3560_v52  ;;  %v3602_v19 = vld [vmem:[#allocation2 + $0x60] sm:$0xff] }
 0x129   : > { %4191 = vst [vmem:[#allocation10_spill] sm:$0xff] %v3592_v9  ;;  %974 = vst.msk [vmem:[#allocation2 + $0x71] sm:$0xff] %vm945_vm4, %v3592_v9  ;;  %v3604_v21 = vld [vmem:[#allocation2 + $0x61] sm:$0xff]  ;;  %v1021_v39 = vadd.f32 %v1013_v7, %v992_v6  ;;  %v1099_v35 = vmul.f32 %v3495_v18, %v3575_v61  ;;  %v1100_v36 = vmul.f32 %v3495_v18, %v3562_v54  ;;  %v3612_v40 = vld [vmem:[#allocation2 + $0x50] sm:$0xff] }
 0x12a   : > { %v3606_v34 = vld [vmem:[#allocation2 + $0x62] sm:$0xff]  ;;  %v1105_v38 = vadd.f32 %v1097_v49, %v1076_v57  ;;  %v995_v41 = vmul.f32 %v3454_v53, %v3602_v19  ;;  %v3616_v42 = vld [vmem:[#allocation2 + $0x51] sm:$0xff]  ;;  %v1016_v43 = vmul.f32 %v3459_v55, %v3604_v21  ;;  %v1051_v46 = vadd.f32 %v1043_v4, %v1022_v12 }
 0x12b   : > { %v3620_v44 = vld [vmem:[#allocation2 + $0x52] sm:$0xff]  ;;  %v1045_v45 = vmul.f32 %v3468_v2, %v3606_v34  ;;  %v994_v48 = vmul.f32 %v3454_v53, %v3612_v40  ;;  %v1015_v49 = vmul.f32 %v3459_v55, %v3616_v42  ;;  %v1050_v57 = vadd.f32 %v1042_v10, %v1021_v39 }
 0x12c   : > { %v1044_v51 = vmul.f32 %v3468_v2, %v3620_v44  ;;  %v1024_v59 = vadd.f32 %v1016_v43, %v995_v41  ;;  %v1072_v0 = vmul.f32 %v3488_v17, %v3612_v40  ;;  %v1073_v1 = vmul.f32 %v3488_v17, %v3602_v19  ;;  %v1062_v4 = vld [vmem:[#allocation2 + $0x80] sm:$0xff] }
 0x12d   : > { %v1077_v6 = vadd.f32 %v1069_v33, %v1048_v13  ;;  %v1023_v7 = vadd.f32 %v1015_v49, %v994_v48  ;;  %v1078_v12 = vadd.f32 %v1070_v14, %v1049_v5  ;;  %v1079_v15 = vadd.f32 %v1071_v16, %v1050_v57  ;;  %v3634_v47 = vld [vmem:[#allocation2 + $0x81] sm:$0xff] }
 0x12e   : > { %v1101_v9 = vmul.f32 %v3495_v18, %v3616_v42  ;;  %v1053_v20 = vadd.f32 %v1045_v45, %v1024_v59  ;;  %v1075_v10 = vmul.f32 %v3488_v17, %v1062_v4  ;;  %v1080_v39 = vadd.f32 %v1072_v0, %v1051_v46  ;;  %v3643_v5 = vld [vmem:[#allocation2 + $0x82] sm:$0xff] }
 0x12f   : > { %v1102_v41 = vmul.f32 %v3495_v18, %v3604_v21  ;;  %v1052_v43 = vadd.f32 %v1044_v51, %v1023_v7  ;;  %v1104_v33 = vmul.f32 %v3495_v18, %v3634_v47  ;;  %v1106_v13 = vadd.f32 %v1098_v50, %v1077_v6 }
 0x130   : > { %v1107_v48 = vadd.f32 %v1099_v35, %v1078_v12  ;;  %v983_v14 = vld [vmem:[#allocation2 + $0x70] sm:$0xff]  ;;  %v1108_v57 = vadd.f32 %v1100_v36, %v1079_v15  ;;  %v1109_v45 = vadd.f32 %v1101_v9, %v1080_v39  ;;  %v1128_v46 = vmul.f32 %v3503_v22, %v3577_v63 }
 0x131   : > { %v1004_v16 = vld [vmem:[#allocation2 + $0x71] sm:$0xff]  ;;  %v1129_v59 = vmul.f32 %v3503_v22, %v3564_v56  ;;  %v996_v51 = vmul.f32 %v3454_v53, %v983_v14  ;;  %v1074_v35 = vmul.f32 %v3488_v17, %v983_v14  ;;  %v1081_v6 = vadd.f32 %v1073_v1, %v1052_v43 }
 0x132   : > { %v3645_v49 = vld [vmem:[#allocation2 + $0x72] sm:$0xff]  ;;  %v1017_v0 = vmul.f32 %v3459_v55, %v1004_v16  ;;  %v1103_v7 = vmul.f32 %v3495_v18, %v1004_v16  ;;  %v1130_v15 = vmul.f32 %v3503_v22, %v3620_v44  ;;  %v1131_v9 = vmul.f32 %v3503_v22, %v3606_v34 }
 0x133   : > { %v1046_v50 = vmul.f32 %v3468_v2, %v3645_v49  ;;  %v1082_v12 = vadd.f32 %v1074_v35, %v1053_v20  ;;  %v1132_v53 = vmul.f32 %v3503_v22, %v3645_v49  ;;  %v1133_v55 = vmul.f32 %v3503_v22, %v3643_v5 }
 0x134   : > { %v1025_v36 = vadd.f32 %v1017_v0, %v996_v51  ;;  %v1110_v2 = vadd.f32 %v1102_v41, %v1081_v6  ;;  %v1134_v17 = vadd.f32 %v3567_v58, %v1105_v38  ;;  %v1135_v1 = vadd.f32 %v3571_v37, %v1106_v13 }
 0x135   : > { %v1136_v18 = vadd.f32 %v1128_v46, %v1107_v48  ;;  %v1111_v43 = vadd.f32 %v1103_v7, %v1082_v12  ;;  %v1137_v29 = vadd.f32 %v1129_v59, %v1108_v57  ;;  %v1138_v8 = vadd.f32 %v1130_v15, %v1109_v45  ;;  %v2706_v7 = vld [vmem:[%s4192_s23] ss:$0 sm:$0xff]  ;;  %s735_s23 = scalar_lea.vmem %s4161_s24, %s4204_s28 }
 0x136   : > { %v1054_v39 = vadd.f32 %v1046_v50, %v1025_v36  ;;  %v1139_v11 = vadd.f32 %v1131_v9, %v1110_v2  ;;  %v1156_v20 = vmul.f32 %v3508_v23, %v3520_v26  ;;  %v1157_v51 = vmul.f32 %v3508_v23, %v3573_v60 }
 0x137   : > { %v1158_v22 = vmul.f32 %v3508_v23, %v3560_v52  ;;  %v1140_v0 = vadd.f32 %v1132_v53, %v1111_v43  ;;  %v1159_v58 = vmul.f32 %v3508_v23, %v3612_v40  ;;  %v1160_v37 = vmul.f32 %v3508_v23, %v3602_v19 }
 0x138   : > { %v1083_v41 = vadd.f32 %v1075_v10, %v1054_v39  ;;  %v1161_v38 = vmul.f32 %v3508_v23, %v983_v14  ;;  %v1162_v13 = vmul.f32 %v3508_v23, %v1062_v4  ;;  %v1164_v48 = vadd.f32 %v1156_v20, %v1134_v17 }
 0x139   : > { %v1165_v26 = vadd.f32 %v1157_v51, %v1135_v1  ;;  %v1166_v45 = vadd.f32 %v1158_v22, %v1136_v18  ;;  %v1167_v60 = vadd.f32 %v1159_v58, %v1137_v29  ;;  %v1168_v46 = vadd.f32 %v1160_v37, %v1138_v8 }
 0x13a   : > { %v1112_v57 = vadd.f32 %v1104_v33, %v1083_v41  ;;  %v1169_v59 = vadd.f32 %v1161_v38, %v1139_v11  ;;  %v1170_v52 = vadd.f32 %v1162_v13, %v1140_v0  ;;  %v1185_v10 = vmul.f32 %v3513_v24, %v3522_v27 }
 0x13b   : > { %v1186_v40 = vmul.f32 %v3513_v24, %v3575_v61  ;;  %v1187_v19 = vmul.f32 %v3513_v24, %v3562_v54  ;;  %v1188_v23 = vmul.f32 %v3513_v24, %v3616_v42  ;;  %v1189_v4 = vmul.f32 %v3513_v24, %v3604_v21 }
 0x13c   : > { %v1141_v50 = vadd.f32 %v1133_v55, %v1112_v57  ;;  %v1190_v8 = vmul.f32 %v3513_v24, %v1004_v16  ;;  %v1191_v11 = vmul.f32 %v3513_v24, %v3634_v47  ;;  %v1193_v29 = vadd.f32 %v1185_v10, %v1164_v48 }
 0x13d   : > { %v1194_v27 = vadd.f32 %v1186_v40, %v1165_v26  ;;  %v1195_v61 = vadd.f32 %v1187_v19, %v1166_v45  ;;  %v1196_v14 = vadd.f32 %v1188_v23, %v1167_v60  ;;  %v1197_v35 = vadd.f32 %v1189_v4, %v1168_v46 }
 0x13e   : > { %v1171_v33 = vadd.f32 %v3530_v30, %v1141_v50  ;;  %v1198_v6 = vadd.f32 %v1190_v8, %v1169_v59  ;;  %v1199_v54 = vadd.f32 %v1191_v11, %v1170_v52  ;;  %v1214_v42 = vmul.f32 %v3518_v25, %v3524_v28 }
 0x13f   : > { %v1215_v21 = vmul.f32 %v3518_v25, %v3577_v63  ;;  %v1216_v24 = vmul.f32 %v3518_v25, %v3564_v56  ;;  %v1217_v47 = vmul.f32 %v3518_v25, %v3620_v44  ;;  %v1218_v30 = vmul.f32 %v3518_v25, %v3606_v34 }
 0x140   : > { %v1200_v16 = vadd.f32 %v3533_v31, %v1171_v33  ;;  %v1219_v28 = vmul.f32 %v3518_v25, %v3645_v49  ;;  %v1220_v63 = vmul.f32 %v3518_v25, %v3643_v5  ;;  %v1222_v31 = vadd.f32 %v1214_v42, %v1193_v29 }
 0x141   : > { %v1223_v15 = vadd.f32 %v1215_v21, %v1194_v27  ;;  %v1224_v9 = vadd.f32 %v1216_v24, %v1195_v61  ;;  %v1225_v56 = vadd.f32 %v1217_v47, %v1196_v14  ;;  %v1226_v36 = vadd.f32 %v1218_v30, %v1197_v35 }
 0x142   : > { %v1229_v44 = vadd.f32 %v3536_v32, %v1200_v16  ;;  %v1227_v12 = vadd.f32 %v1219_v28, %v1198_v6  ;;  %v1228_v53 = vadd.f32 %v1220_v63, %v1199_v54  ;;  %v1237_v34 = vadd.f32 %v2706_v7, %v1222_v31 }
 0x143   : > { %v1238_v55 = vadd.f32 %v2706_v7, %v1223_v15  ;;  %v1239_v2 = vadd.f32 %v2706_v7, %v1224_v9  ;;  %v1240_v17 = vadd.f32 %v2706_v7, %v1225_v56  ;;  %v1241_v1 = vadd.f32 %v2706_v7, %v1226_v36 }
 0x144   : > { %v1242_v18 = vadd.f32 %v2706_v7, %v1227_v12  ;;  %v3712_v39 = vadd.f32 %v2706_v7, %v1228_v53  ;;  %v2707_v49 = vmul.f32 -1.442695, %v1237_v34  ;;  %v1244_v25 = vadd.f32 %v2706_v7, %v1229_v44 }
 0x145   : > { %v2708_v43 = vmul.f32 -1.442695, %v1238_v55  ;;  %v2709_v5 = vmul.f32 -1.442695, %v1239_v2  ;;  %v2710_v20 = vmul.f32 -1.442695, %v1240_v17 }
 0x146   : > { %3113 = vpow2.f32 %v2707_v49  ;;  %v2711_v51 = vmul.f32 -1.442695, %v1241_v1  ;;  %v2712_v22 = vmul.f32 -1.442695, %v1242_v18  ;;  %v2713_v32 = vmul.f32 -1.442695, %v3712_v39 }
 0x147   : > { %3115 = vpow2.f32 %v2708_v43  ;;  %v2714_v41 = vmul.f32 -1.442695, %v1244_v25  ;;  %v4193_v43 = vmov 0.0  }
 0x148   : > { %3117 = vpow2.f32 %v2709_v5  ;;  %v1325_v5 = vld [vmem:[%s4195_s4] sm:$0x1]  ;;  %1848 = vst.msk [vmem:[#allocation3 + $0x20] sm:$0xff] %vm1842_vm9, %v4193_v43  ;;  %1843 = vst.msk [vmem:[#allocation3] sm:$0xff] %vm1842_vm9, %v4193_v43 }
 0x149   : > { %3119 = vpow2.f32 %v2710_v20  ;;  %1849 = vst.msk [vmem:[#allocation3 + $0x28] sm:$0x3] %vm1844_vm10, %v4193_v43  ;;  %1845 = vst.msk [vmem:[#allocation3 + $0x8] sm:$0x3] %vm1844_vm10, %v4193_v43 }
 0x14a   : > { %3121 = vpow2.f32 %v2711_v51  ;;  %1846 = vst.msk [vmem:[#allocation3 + $0x10] sm:$0xff] %vm1842_vm9, %v4193_v43  ;;  %1850 = vst.msk [vmem:[#allocation3 + $0x30] sm:$0xff] %vm1842_vm9, %v4193_v43 }
 0x14b   : > { %3123 = vpow2.f32 %v2712_v22  ;;  %1847 = vst.msk [vmem:[#allocation3 + $0x18] sm:$0x3] %vm1844_vm10, %v4193_v43  ;;  %1851 = vst.msk [vmem:[#allocation3 + $0x38] sm:$0x3] %vm1844_vm10, %v4193_v43 }
 0x14c   : > { %3125 = vpow2.f32 %v2713_v32  ;;  %1852 = vst.msk [vmem:[#allocation3 + $0x40] sm:$0xff] %vm1842_vm9, %v4193_v43  ;;  %1854 = vst.msk [vmem:[#allocation3 + $0x50] sm:$0xff] %vm1842_vm9, %v4193_v43 }
 0x14d   : > { %3127 = vpow2.f32 %v2714_v41  ;;  %1853 = vst.msk [vmem:[#allocation3 + $0x48] sm:$0x3] %vm1844_vm10, %v4193_v43  ;;  %1855 = vst.msk [vmem:[#allocation3 + $0x58] sm:$0x3] %vm1844_vm10, %v4193_v43 }
 0x14e   : > { %1856 = vst.msk [vmem:[#allocation3 + $0x60] sm:$0xff] %vm1842_vm9, %v4193_v43  ;;  %1858 = vst.msk [vmem:[#allocation3 + $0x70] sm:$0xff] %vm1842_vm9, %v4193_v43 }
 0x14f   : > { %1857 = vst.msk [vmem:[#allocation3 + $0x68] sm:$0x3] %vm1844_vm10, %v4193_v43  ;;  %1859 = vst.msk [vmem:[#allocation3 + $0x78] sm:$0x3] %vm1844_vm10, %v4193_v43 }
 0x150   : > { %v3114_v0 = vpop.eup %3113  ;;  %1860 = vst.msk [vmem:[#allocation3 + $0x80] sm:$0xff] %vm1842_vm9, %v4193_v43  ;;  %1862 = vst.msk [vmem:[#allocation3 + $0x90] sm:$0xff] %vm1842_vm9, %v4193_v43 }
 0x151   : > { %v3116_v58 = vpop.eup %3115  ;;  %v1269_v37 = vadd.f32 1.0, %v3114_v0  ;;  %1861 = vst.msk [vmem:[#allocation3 + $0x88] sm:$0x3] %vm1844_vm10, %v4193_v43  ;;  %1863 = vst.msk [vmem:[#allocation3 + $0x98] sm:$0x3] %vm1844_vm10, %v4193_v43 }
 0x152   : > { %v3118_v38 = vpop.eup %3117  ;;  %v1270_v13 = vadd.f32 1.0, %v3116_v58 }
 0x153   : > { %v3120_v48 = vpop.eup %3119  ;;  %v1271_v26 = vadd.f32 1.0, %v3118_v38  ;;  %3129 = vrcp.f32 %v1269_v37  ;;  %v1504_v38 = vld [vmem:[%s4146_s9] sm:$0xff] }
 0x154   : > { %v3122_v57 = vpop.eup %3121  ;;  %v1272_v45 = vadd.f32 1.0, %v3120_v48  ;;  %3131 = vrcp.f32 %v1270_v13  ;;  %v1649_v13 = vld [vmem:[%s4148_s11] sm:$0xff] }
 0x155   : > { %v3124_v60 = vpop.eup %3123  ;;  %v1273_v46 = vadd.f32 1.0, %v3122_v57  ;;  %3133 = vrcp.f32 %v1271_v26  ;;  %2895 = vmatprep.subr.mxu0 %v1649_v13  ;;  %v1407_v48 = vld [vmem:[%s4196_s0] sm:$0x1] }
 0x156   : > { %v3126_v59 = vpop.eup %3125  ;;  %v1274_v52 = vadd.f32 1.0, %v3124_v60  ;;  %3135 = vrcp.f32 %v1272_v45  ;;  %2896 = vmatpush3.msra.mxu0 %v1649_v13 }
 0x157   : > { %v3128_v10 = vpop.eup %3127  ;;  %v1275_v40 = vadd.f32 1.0, %v3126_v59  ;;  %3137 = vrcp.f32 %v1273_v46 }
 0x158   : > { %v1276_v50 = vadd.f32 1.0, %v3128_v10  ;;  %3139 = vrcp.f32 %v1274_v52  ;;  %v1492_v52 = vlaneseq }
 0x159   : > { %3141 = vrcp.f32 %v1275_v40 }
 0x15a   : > { %3143 = vrcp.f32 %v1276_v50  ;;  %v3768_v10 = vshrl.u32 %v1492_v52, 7 }
 0x15c   : > { %v1494_v40 = vsub.s32 0, %v3768_v10  ;;  %v2538_v10 = vld [vmem:[%s4159_s22 + $0x10] sm:$0xff] }
 0x15d   : > { %v3130_v19 = vpop.eup %3129 }
 0x15e   : > { %v3132_v23 = vpop.eup %3131  ;;  %v3715_v4 = vmul.f32 %v3130_v19, %v1237_v34 }
 0x15f   : > { %v3134_v8 = vpop.eup %3133  ;;  %v3717_v11 = vmul.f32 %v3132_v23, %v1238_v55 }
 0x160   : > { %v3136_v29 = vpop.eup %3135  ;;  %v3719_v27 = vmul.f32 %v3134_v8, %v1239_v2  ;;  %v1301_v14 = vsel %vm945_vm4, %v3715_v4, 0.0 }
 0x161   : > { %v3138_v33 = vpop.eup %3137  ;;  %v3721_v61 = vmul.f32 %v3136_v29, %v1240_v17  ;;  %v1302_v35 = vsel %vm945_vm4, %v3717_v11, 0.0 }
 0x162   : > { %v3140_v6 = vpop.eup %3139  ;;  %v1303_v54 = vadd.f32 %v1302_v35, %v1301_v14  ;;  %v3727_v21 = vmul.f32 %v3138_v33, %v1241_v1  ;;  %v1304_v24 = vsel %vm945_vm4, %v3719_v27, 0.0 }
 0x163   : > { %v3142_v42 = vpop.eup %3141  ;;  %v3729_v16 = vmul.f32 %v3140_v6, %v1242_v18  ;;  %v1306_v47 = vsel %vm945_vm4, %v3721_v61, 0.0 }
 0x164   : > { %v3144_v30 = vpop.eup %3143  ;;  %v1305_v7 = vadd.f32 %v1304_v24, %v1303_v54  ;;  %v3736_v63 = vmul.f32 %v3142_v42, %v3712_v39  ;;  %v1308_v15 = vsel %vm945_vm4, %v3727_v21, 0.0 }
 0x165   : > { %v3738_v31 = vmul.f32 %v3144_v30, %v1244_v25  ;;  %v1310_v9 = vsel %vm945_vm4, %v3729_v16, 0.0  ;;  %v1406_v25 = vld [vmem:[%s4194_s30] sm:$0x3] }
 0x166   : > { %v1307_v28 = vadd.f32 %v1306_v47, %v1305_v7  ;;  %v1312_v44 = vsel %vm945_vm4, %v3736_v63, 0.0 }
 0x167   : > { %v1314_v12 = vsel %vm945_vm4, %v3738_v31, 0.0 }
 0x168   : > { %v1309_v56 = vadd.f32 %v1308_v15, %v1307_v28  ;;  %v4197_v28 = vld [vmem:[#allocation6_spill] sm:$0xff]  ;;  %v4198_v15 = vld [vmem:[#allocation5_spill] sm:$0xff] }
 0x16a   : > { %v1311_v36 = vadd.f32 %v1310_v9, %v1309_v56 }
 0x16c   : > { %v1313_v53 = vadd.f32 %v1312_v44, %v1311_v36 }
 0x16e   : > { %v1315_v34 = vadd.f32 %v1314_v12, %v1313_v53  ;;  %v4200_v53 = vld [vmem:[#allocation7_spill] sm:$0xff] }
 0x170   : > { %v1316_v55 = vrot.slane %v1315_v34, 4 }
 0x172   : > { %v1317_v2 = vadd.f32 %v1316_v55, %v1315_v34 }
 0x174   : > { %v1318_v17 = vrot.slane %v1317_v2, 2 }
 0x176   : > { %v1319_v1 = vadd.f32 %v1318_v17, %v1317_v2 }
 0x178   : > { %v1320_v18 = vrot.slane %v1319_v1, 1 }
 0x17a   : > { %v1321_v39 = vadd.f32 %v1320_v18, %v1319_v1  ;;  %v4201_v1 = vld [vmem:[#allocation10_spill] sm:$0xff] }
 0x17c   : > { %v1323_v49 = vmul.f32 0.015625, %v1321_v39  ;;  %v4202_v39 = vld [vmem:[#allocation9_spill] sm:$0xff] }
 0x17e   : > { %2874 = vmatmul.mubr.msk.f32.vlgmr.msra.gmra.mrb[0].mxu1 %vm945_vm4, %v1323_v49 }
 0x17f   : > { %2878 = vmatprep.mubr.msk.f32.mxu1 %vm3219_vm6, %v4193_v43  ;;  %2877 = vmatpush3.msk.msra.mxu1 %vm1412_vm7, %v1406_v25  ;;  %v2127_v25 = vld [vmem:[%s4152_s15] sm:$0xff] }
 0x180   : > { %2881 = vmatprep.subr.mxu1 %v1504_v38 }
 0x251   : > { %v1395_v20 = vpop.f32.mrb[0].mxu1 }
 0x252   : > { %v1396_v51 = vadd.f32 %v1395_v20, %v1325_v5  ;;  %v2875_v22 = vpop.f32.mrb[1].mxu1  ;;  %v2729_v5 = vld [vmem:[%s4149_s12] ss:$0 sm:$0xff] }
 0x254   : > { %v2716_v32 = vmul.f32 -1.442695, %v1396_v51 }
 0x256   : > { %3145 = vpow2.f32 %v2716_v32 }
 0x260   : > { %v3146_v41 = vpop.eup %3145 }
 0x261   : > { %v1402_v0 = vadd.f32 1.0, %v3146_v41 }
 0x263   : > { %3147 = vrcp.f32 %v1402_v0 }
 0x26d   : > { %v3148_v58 = vpop.eup %3147 }
 0x26e   : > { %v1405_v37 = vmul.f32 %v3148_v58, %v1396_v51 }
 0x270   : > { %2879 = vmatmul.mubr.msk.f32.vlgmr.msra.gmra.mrb[2].mxu1 %vm1408_vm8, %v1405_v37 }
 0x271   : > { %2882 = vmatpush3.msra.mxu1 %v1504_v38 }
 0x343   : > { %v1482_v26 = vpop.f32.mrb[2].mxu1 }
 0x344   : > { %v1483_v57 = vadd.f32 %v1482_v26, %v1407_v48  ;;  %v2880_v45 = vpop.f32.mrb[3].mxu1 }
 0x346   : > { %v2719_v60 = vmul.f32 -1.442695, %v1483_v57 }
 0x348   : > { %3149 = vpow2.f32 %v2719_v60 }
 0x352   : > { %v3150_v46 = vpop.eup %3149 }
 0x353   : > { %v1489_v59 = vadd.f32 1.0, %v3150_v46 }
 0x355   : > { %3151 = vrcp.f32 %v1489_v59 }
 0x35f   : > { %v3152_v50 = vpop.eup %3151 }
 0x360   : > { %v1495_v19 = vrot.slane %v3152_v50, %v1494_v40 }
 0x362   : > { %v1496_v23 = vmul.f32 %v1495_v19, %v3715_v4  ;;  %v1497_v8 = vmul.f32 %v1495_v19, %v3717_v11  ;;  %v1498_v29 = vmul.f32 %v1495_v19, %v3719_v27  ;;  %v1499_v33 = vmul.f32 %v1495_v19, %v3721_v61  ;;  %v2720_v61 = vld [vmem:[%s4147_s10] ss:$0 sm:$0xff] }
 0x363   : > { %v1500_v14 = vmul.f32 %v1495_v19, %v3727_v21  ;;  %v1501_v4 = vmul.f32 %v1495_v19, %v3729_v16  ;;  %v1502_v11 = vmul.f32 %v1495_v19, %v3736_v63  ;;  %v1503_v27 = vmul.f32 %v1495_v19, %v3738_v31 }
 0x364   : > { %2883 = vmatprep.mubr.msk.f32.mxu1 %vm945_vm4, %v1496_v23 }
 0x365   : > { %2884 = vmatmul.mubr.msk.f32.vlgmr.msra.gmra.mrb[4].mxu1 %vm945_vm4, %v1497_v8 }
 0x366   : > { %2886 = vmatprep.mubr.msk.f32.mxu1 %vm945_vm4, %v1498_v29 }
 0x369   : > { %2887 = vmatmul.mubr.msk.f32.gmra.mrb[6].mxu1 %vm945_vm4, %v1499_v33 }
 0x36a   : > { %2889 = vmatprep.mubr.msk.f32.mxu1 %vm945_vm4, %v1500_v14 }
 0x36d   : > { %2890 = vmatmul.mubr.msk.f32.gmra.mrb[8].mxu1 %vm945_vm4, %v1501_v4 }
 0x36e   : > { %2892 = vmatprep.mubr.msk.f32.mxu1 %vm945_vm4, %v1502_v11 }
 0x371   : > { %2893 = vmatmul.mubr.msk.f32.gmra.mrb[10].mxu1 %vm945_vm4, %v1503_v27 }
 0x372   : > { %2925 = vmatprep.mubr.msk.f32.mxu1 %vm2136_vm11, %v2127_v25 }
 0x438   : > { %v2885_v35 = vpop.f32.mrb[4].mxu1 }
 0x439   : > { %v1608_v6 = vadd.f32 %v2885_v35, %v2720_v61  ;;  %v1602_v54 = vpop.f32.mrb[5].mxu1 }
 0x43a   : > { %v1603_v42 = vadd.f32 %v2720_v61, %v1602_v54 }
 0x43b   : > { %v1642_v24 = vadd.f32 %v1608_v6, %v3461_v62  ;;  %v4199_v62 = vld [vmem:[#allocation8_spill] sm:$0xff] }
 0x43c   : > { %v1641_v21 = vadd.f32 %v1603_v42, %v3470_v3  ;;  %v2888_v16 = vpop.f32.mrb[6].mxu1 }
 0x43d   : > { %v1618_v47 = vadd.f32 %v2888_v16, %v2720_v61  ;;  %v1612_v30 = vpop.f32.mrb[7].mxu1 }
 0x43e   : > { %v1613_v7 = vadd.f32 %v2720_v61, %v1612_v30  ;;  %2897 = vmatprep.mubr.msk.f32.mxu0 %vm945_vm4, %v1641_v21 }
 0x43f   : > { %2898 = vmatmul.mubr.msk.f32.vlgmr.msra.gmra.mrb[8].mxu0 %vm945_vm4, %v1642_v24  ;;  %v1644_v9 = vadd.f32 %v1618_v47, %v4198_v15  ;;  %v1873_v47 = vld [vmem:[#allocation3] sm:$0xff] }
 0x440   : > { %v1643_v63 = vadd.f32 %v1613_v7, %v4197_v28  ;;  %v2891_v31 = vpop.f32.mrb[8].mxu1  ;;  %v3875_v7 = vld [vmem:[%s4150_s13] ss:$0 sm:$0xff]  ;;  %v1894_v28 = vld [vmem:[#allocation3 + $0x1] sm:$0xff] }
 0x441   : > { %v1628_v56 = vadd.f32 %v2891_v31, %v2720_v61  ;;  %v1622_v36 = vpop.f32.mrb[9].mxu1 }
 0x442   : > { %v1623_v44 = vadd.f32 %v2720_v61, %v1622_v36  ;;  %2900 = vmatprep.mubr.msk.f32.mxu0 %vm945_vm4, %v1643_v63  ;;  %v3880_v63 = vld [vmem:[%s4150_s13 + $0x1] ss:$0 sm:$0xff] }
 0x443   : > { %2901 = vmatmul.mubr.msk.f32.gmra.mrb[10].mxu0 %vm945_vm4, %v1644_v9  ;;  %v1646_v34 = vadd.f32 %v1628_v56, %v4200_v53  ;;  %v1923_v53 = vld [vmem:[#allocation3 + $0x2] sm:$0xff] }
 0x444   : > { %v1645_v3 = vadd.f32 %v1623_v44, %v4199_v62  ;;  %v2894_v12 = vpop.f32.mrb[10].mxu1  ;;  %v1886_v62 = vmul.f32 %v3875_v7, %v1873_v47 }
 0x445   : > { %v1638_v55 = vadd.f32 %v2894_v12, %v2720_v61  ;;  %v1632_v2 = vpop.f32.mrb[11].mxu1 }
 0x446   : > { %v1633_v17 = vadd.f32 %v2720_v61, %v1632_v2  ;;  %2903 = vmatprep.mubr.msk.f32.mxu0 %vm945_vm4, %v1645_v3  ;;  %v1907_v3 = vmul.f32 %v3880_v63, %v1894_v28 }
 0x447   : > { %2904 = vmatmul.mubr.msk.f32.gmra.mrb[12].mxu0 %vm945_vm4, %v1646_v34  ;;  %v1648_v49 = vadd.f32 %v1638_v55, %v4202_v39  ;;  %v3888_v34 = vld [vmem:[%s4150_s13 + $0x2] ss:$0 sm:$0xff] }
 0x448   : > { %v1647_v18 = vadd.f32 %v1633_v17, %v4201_v1  ;;  %v1936_v39 = vmul.f32 %v3888_v34, %v1923_v53 }
 0x44a   : > { %2906 = vmatprep.mubr.msk.f32.mxu0 %vm945_vm4, %v1647_v18  ;;  %v1915_v18 = vadd.f32 %v1907_v3, %v1886_v62 }
 0x44b   : > { %2907 = vmatmul.mubr.msk.f32.gmra.mrb[14].mxu0 %vm945_vm4, %v1648_v49 }
 0x44c   : > { %2995 = vmatprep.mubr.msk.f32.mxu0 %vm3219_vm6, %v4193_v43 }
 0x512   : > { %v2899_v20 = vpop.f32.mrb[8].mxu0 }
 0x513   : > { %v1753_v51 = vadd.f32 %v2899_v20, %v2729_v5  ;;  %v1747_v22 = vpop.f32.mrb[9].mxu0  ;;  %v3899_v20 = vld [vmem:[%s4150_s13 + $0x3] ss:$0 sm:$0xff] }
 0x514   : > { %v1748_v32 = vadd.f32 %v2729_v5, %v1747_v22  ;;  %v3909_v22 = vld [vmem:[%s4150_s13 + $0x5] ss:$0 sm:$0xff] }
 0x515   : > { %v2739_v41 = vmul.f32 -1.442695, %v1753_v51 }
 0x516   : > { %v2738_v0 = vmul.f32 -1.442695, %v1748_v32  ;;  %v2902_v58 = vpop.f32.mrb[10].mxu0 }
 0x517   : > { %3153 = vpow2.f32 %v2739_v41  ;;  %v3857_v37 = vadd.f32 %v2902_v58, %v2729_v5  ;;  %v1757_v38 = vpop.f32.mrb[11].mxu0  ;;  %v1944_v41 = vadd.f32 %v1936_v39, %v1915_v18 }
 0x518   : > { %3155 = vpow2.f32 %v2738_v0  ;;  %v1758_v13 = vadd.f32 %v2729_v5, %v1757_v38 }
 0x519   : > { %v2741_v48 = vmul.f32 -1.442695, %v3857_v37 }
 0x51a   : > { %v2740_v26 = vmul.f32 -1.442695, %v1758_v13  ;;  %v2905_v57 = vpop.f32.mrb[12].mxu0 }
 0x51b   : > { %3157 = vpow2.f32 %v2741_v48  ;;  %v3860_v45 = vadd.f32 %v2905_v57, %v2729_v5  ;;  %v1767_v60 = vpop.f32.mrb[13].mxu0 }
 0x51c   : > { %3159 = vpow2.f32 %v2740_v26  ;;  %v3862_v46 = vadd.f32 %v2729_v5, %v1767_v60 }
 0x51d   : > { %v2743_v59 = vmul.f32 -1.442695, %v3860_v45 }
 0x51e   : > { %v2742_v52 = vmul.f32 -1.442695, %v3862_v46  ;;  %v2908_v50 = vpop.f32.mrb[14].mxu0 }
 0x51f   : > { %3161 = vpow2.f32 %v2743_v59  ;;  %v3866_v19 = vadd.f32 %v2908_v50, %v2729_v5  ;;  %v1777_v23 = vpop.f32.mrb[15].mxu0  ;;  %v3921_v59 = vld [vmem:[%s4150_s13 + $0x6] ss:$0 sm:$0xff] }
 0x520   : > { %3163 = vpow2.f32 %v2742_v52  ;;  %v3868_v8 = vadd.f32 %v2729_v5, %v1777_v23  ;;  %v3926_v52 = vld [vmem:[%s4150_s13 + $0x7] ss:$0 sm:$0xff] }
 0x521   : > { %v3154_v29 = vpop.eup %3153  ;;  %v2745_v33 = vmul.f32 -1.442695, %v3866_v19 }
 0x522   : > { %v3156_v14 = vpop.eup %3155  ;;  %v1811_v4 = vadd.f32 1.0, %v3154_v29  ;;  %v2744_v11 = vmul.f32 -1.442695, %v3868_v8 }
 0x523   : > { %v1810_v27 = vadd.f32 1.0, %v3156_v14  ;;  %3165 = vpow2.f32 %v2745_v33  ;;  %v3935_v14 = vld [vmem:[%s4150_s13 + $0x8] ss:$0 sm:$0xff] }
 0x524   : > { %3167 = vrcp.f32 %v1811_v4 }
 0x525   : > { %v3158_v61 = vpop.eup %3157  ;;  %3169 = vrcp.f32 %v1810_v27 }
 0x526   : > { %v3160_v35 = vpop.eup %3159  ;;  %v1813_v6 = vadd.f32 1.0, %v3158_v61  ;;  %3171 = vpow2.f32 %v2744_v11 }
 0x527   : > { %v1812_v54 = vadd.f32 1.0, %v3160_v35 }
 0x528   : > { %3173 = vrcp.f32 %v1813_v6 }
 0x529   : > { %v3162_v42 = vpop.eup %3161  ;;  %3175 = vrcp.f32 %v1812_v54 }
 0x52a   : > { %v3164_v21 = vpop.eup %3163  ;;  %v1815_v16 = vadd.f32 1.0, %v3162_v42 }
 0x52b   : > { %v1814_v24 = vadd.f32 1.0, %v3164_v21 }
 0x52c   : > { %3177 = vrcp.f32 %v1815_v16 }
 0x52d   : > { %v3166_v30 = vpop.eup %3165  ;;  %3179 = vrcp.f32 %v1814_v24 }
 0x52e   : > { %v3168_v31 = vpop.eup %3167  ;;  %v1817_v15 = vadd.f32 1.0, %v3166_v30 }
 0x52f   : > { %v3170_v9 = vpop.eup %3169  ;;  %v1835_v56 = vmul.f32 %v3168_v31, %v1753_v51  ;;  %v3904_v51 = vld [vmem:[%s4150_s13 + $0x4] ss:$0 sm:$0xff] }
 0x530   : > { %v3172_v36 = vpop.eup %3171  ;;  %v1834_v44 = vmul.f32 %v3170_v9, %v1748_v32  ;;  %3181 = vrcp.f32 %v1817_v15 }
 0x531   : > { %1866 = vst.msk [vmem:[#allocation3 + $0x21] sm:$0xff] %vm1842_vm9, %v1835_v56  ;;  %v1816_v12 = vadd.f32 1.0, %v3172_v36 }
 0x532   : > { %v3174_v55 = vpop.eup %3173  ;;  %1865 = vst.msk [vmem:[#allocation3 + $0x11] sm:$0xff] %vm1842_vm9, %v1834_v44 }
 0x533   : > { %v3176_v2 = vpop.eup %3175  ;;  %v1837_v17 = vmul.f32 %v3174_v55, %v3857_v37  ;;  %3183 = vrcp.f32 %v1816_v12 }
 0x534   : > { %v1836_v1 = vmul.f32 %v3176_v2, %v1758_v13 }
 0x535   : > { %1868 = vst.msk [vmem:[#allocation3 + $0x41] sm:$0xff] %vm1842_vm9, %v1837_v17 }
 0x536   : > { %v3178_v49 = vpop.eup %3177  ;;  %1867 = vst.msk [vmem:[#allocation3 + $0x31] sm:$0xff] %vm1842_vm9, %v1836_v1 }
 0x537   : > { %v3180_v25 = vpop.eup %3179  ;;  %v1839_v5 = vmul.f32 %v3178_v49, %v3860_v45 }
 0x538   : > { %v1838_v32 = vmul.f32 %v3180_v25, %v3862_v46  ;;  %v1953_v0 = vld [vmem:[#allocation3 + $0x20] sm:$0xff] }
 0x539   : > { %v1982_v58 = vld [vmem:[#allocation3 + $0x21] sm:$0xff]  ;;  %1870 = vst.msk [vmem:[#allocation3 + $0x61] sm:$0xff] %vm1842_vm9, %v1839_v5  ;;  %v1874_v38 = vld [vmem:[#allocation3 + $0x10] sm:$0xff]  ;;  %v1966_v46 = vmul.f32 %v3899_v20, %v1953_v0  ;;  %v1888_v61 = vmul.f32 %v3875_v7, %v1953_v0  ;;  %v2053_v42 = vmul.f32 %v3921_v59, %v1953_v0 }
 0x53a   : > { %v2011_v37 = vld [vmem:[#allocation3 + $0x22] sm:$0xff]  ;;  %v1895_v13 = vld [vmem:[#allocation3 + $0x11] sm:$0xff]  ;;  %v3182_v26 = vpop.eup %3181  ;;  %1869 = vst.msk [vmem:[#allocation3 + $0x51] sm:$0xff] %vm1842_vm9, %v1838_v32  ;;  %v1887_v57 = vmul.f32 %v3875_v7, %v1874_v38  ;;  %v1965_v60 = vmul.f32 %v3899_v20, %v1874_v38  ;;  %v1995_v29 = vmul.f32 %v3904_v51, %v1982_v58  ;;  %v2082_v16 = vmul.f32 %v3926_v52, %v1982_v58 }
 0x53b   : > { %v1924_v48 = vld [vmem:[#allocation3 + $0x12] sm:$0xff]  ;;  %v1908_v45 = vmul.f32 %v3880_v63, %v1895_v13  ;;  %v1841_v50 = vmul.f32 %v3182_v26, %v3866_v19  ;;  %v2024_v33 = vmul.f32 %v3909_v22, %v2011_v37  ;;  %v1994_v27 = vmul.f32 %v3904_v51, %v1895_v13 }
 0x53c   : > { %v1937_v23 = vmul.f32 %v3888_v34, %v1924_v48  ;;  %v1973_v11 = vadd.f32 %v1965_v60, %v1944_v41  ;;  %v1955_v35 = vld [vmem:[#allocation3 + $0x40] sm:$0xff]  ;;  %v2023_v19 = vmul.f32 %v3909_v22, %v1924_v48  ;;  %v1909_v24 = vmul.f32 %v3880_v63, %v1982_v58 }
 0x53d   : > { %v1916_v4 = vadd.f32 %v1908_v45, %v1887_v57  ;;  %v3184_v6 = vpop.eup %3183  ;;  %1872 = vst.msk [vmem:[#allocation3 + $0x81] sm:$0xff] %vm1842_vm9, %v1841_v50  ;;  %v2041_v54 = vld [vmem:[#allocation3 + $0x30] sm:$0xff]  ;;  %v1984_v47 = vld [vmem:[#allocation3 + $0x41] sm:$0xff]  ;;  %v2111_v9 = vmul.f32 %v3935_v14, %v2011_v37  ;;  %v1938_v44 = vmul.f32 %v3888_v34, %v2011_v37  ;;  %v1968_v62 = vmul.f32 %v3899_v20, %v1955_v35 }
 0x53e   : > { %v2070_v21 = vld [vmem:[#allocation3 + $0x31] sm:$0xff]  ;;  %v1840_v30 = vmul.f32 %v3184_v6, %v3868_v8  ;;  %v2002_v31 = vadd.f32 %v1994_v27, %v1973_v11  ;;  %v1889_v56 = vmul.f32 %v3875_v7, %v2041_v54  ;;  %v1917_v53 = vadd.f32 %v1909_v24, %v1888_v61  ;;  %v2013_v18 = vld [vmem:[#allocation3 + $0x42] sm:$0xff] }
 0x53f   : > { %v1945_v28 = vadd.f32 %v1937_v23, %v1916_v4  ;;  %v2099_v15 = vld [vmem:[#allocation3 + $0x32] sm:$0xff]  ;;  %v1910_v36 = vmul.f32 %v3880_v63, %v2070_v21  ;;  %v1997_v8 = vmul.f32 %v3904_v51, %v1984_v47  ;;  %v2054_v55 = vmul.f32 %v3921_v59, %v2041_v54 }
 0x540   : > { %1871 = vst.msk [vmem:[#allocation3 + $0x71] sm:$0xff] %vm1842_vm9, %v1840_v30  ;;  %v2031_v12 = vadd.f32 %v2023_v19, %v2002_v31  ;;  %v1939_v17 = vmul.f32 %v3888_v34, %v2099_v15  ;;  %v1967_v1 = vmul.f32 %v3899_v20, %v2041_v54  ;;  %v2083_v25 = vmul.f32 %v3926_v52, %v2070_v21  ;;  %v1957_v30 = vld [vmem:[#allocation3 + $0x60] sm:$0xff] }
 0x541   : > { %v1974_v3 = vadd.f32 %v1966_v46, %v1945_v28  ;;  %v1918_v2 = vadd.f32 %v1910_v36, %v1889_v56  ;;  %v1946_v5 = vadd.f32 %v1938_v44, %v1917_v53  ;;  %v2043_v32 = vld [vmem:[#allocation3 + $0x50] sm:$0xff]  ;;  %v2112_v41 = vmul.f32 %v3935_v14, %v2099_v15 }
 0x542   : > { %v2061_v49 = vadd.f32 %v2053_v42, %v2031_v12  ;;  %v1996_v58 = vmul.f32 %v3904_v51, %v2070_v21  ;;  %v2025_v37 = vmul.f32 %v3909_v22, %v2099_v15  ;;  %v2026_v48 = vmul.f32 %v3909_v22, %v2013_v18  ;;  %v2072_v57 = vld [vmem:[#allocation3 + $0x51] sm:$0xff] }
 0x543   : > { %v2003_v39 = vadd.f32 %v1995_v29, %v1974_v3  ;;  %v1947_v0 = vadd.f32 %v1939_v17, %v1918_v2  ;;  %v1975_v13 = vadd.f32 %v1967_v1, %v1946_v5  ;;  %v2055_v26 = vmul.f32 %v3921_v59, %v1955_v35  ;;  %v2101_v50 = vld [vmem:[#allocation3 + $0x52] sm:$0xff] }
 0x544   : > { %v2056_v60 = vmul.f32 %v3921_v59, %v2043_v32  ;;  %v2084_v46 = vmul.f32 %v3926_v52, %v1984_v47  ;;  %v1890_v23 = vmul.f32 %v3875_v7, %v1955_v35  ;;  %v2090_v4 = vadd.f32 %v2082_v16, %v2061_v49 }
 0x545   : > { %v2032_v38 = vadd.f32 %v2024_v33, %v2003_v39  ;;  %v1976_v45 = vadd.f32 %v1968_v62, %v1947_v0  ;;  %v2004_v11 = vadd.f32 %v1996_v58, %v1975_v13  ;;  %v1891_v27 = vmul.f32 %v3875_v7, %v2043_v32 }
 0x546   : > { %v2085_v61 = vmul.f32 %v3926_v52, %v2072_v57  ;;  %v1911_v6 = vmul.f32 %v3880_v63, %v1984_v47  ;;  %v1912_v19 = vmul.f32 %v3880_v63, %v2072_v57  ;;  %v1940_v21 = vmul.f32 %v3888_v34, %v2013_v18  ;;  %v1986_v47 = vld [vmem:[#allocation3 + $0x61] sm:$0xff] }
 0x547   : > { %v2062_v29 = vadd.f32 %v2054_v55, %v2032_v38  ;;  %v2005_v33 = vadd.f32 %v1997_v8, %v1976_v45  ;;  %v2033_v42 = vadd.f32 %v2025_v37, %v2004_v11  ;;  %v1941_v24 = vmul.f32 %v3888_v34, %v2101_v50  ;;  %v2015_v8 = vld [vmem:[#allocation3 + $0x62] sm:$0xff]  ;;  %v2045_v55 = vld [vmem:[#allocation3 + $0x70] sm:$0xff] }
 0x548   : > { %v1919_v28 = vadd.f32 %v1911_v6, %v1890_v23  ;;  %v1920_v16 = vadd.f32 %v1912_v19, %v1891_v27  ;;  %v1969_v31 = vmul.f32 %v3899_v20, %v2043_v32  ;;  %v2119_v15 = vadd.f32 %v2111_v9, %v2090_v4  ;;  %v1959_v11 = vld [vmem:[#allocation3 + $0x80] sm:$0xff] }
 0x549   : > { %v2091_v54 = vadd.f32 %v2083_v25, %v2062_v29  ;;  %v2034_v35 = vadd.f32 %v2026_v48, %v2005_v33  ;;  %v2063_v36 = vadd.f32 %v2055_v26, %v2033_v42  ;;  %v2113_v44 = vmul.f32 %v3935_v14, %v2013_v18  ;;  %v2074_v18 = vld [vmem:[#allocation3 + $0x71] sm:$0xff] }
 0x54a   : > { %v1948_v3 = vadd.f32 %v1940_v21, %v1919_v28  ;;  %v1949_v12 = vadd.f32 %v1941_v24, %v1920_v16  ;;  %v1970_v53 = vmul.f32 %v3899_v20, %v1957_v30  ;;  %v2114_v1 = vmul.f32 %v3935_v14, %v2101_v50  ;;  %v2103_v26 = vld [vmem:[#allocation3 + $0x72] sm:$0xff] }
 0x54b   : > { %v2120_v56 = vadd.f32 %v2112_v41, %v2091_v54  ;;  %v2064_v62 = vadd.f32 %v2056_v60, %v2034_v35  ;;  %v2092_v17 = vadd.f32 %v2084_v46, %v2063_v36  ;;  %v1998_v39 = vmul.f32 %v3904_v51, %v2072_v57  ;;  %v2047_v35 = vld [vmem:[#allocation3 + $0x90] sm:$0xff] }
 0x54c   : > { %v1977_v9 = vadd.f32 %v1969_v31, %v1948_v3  ;;  %v1978_v25 = vadd.f32 %v1970_v53, %v1949_v12  ;;  %v1999_v5 = vmul.f32 %v3904_v51, %v1986_v47  ;;  %v2027_v32 = vmul.f32 %v3909_v22, %v2101_v50  ;;  %v2076_v53 = vld [vmem:[#allocation3 + $0x91] sm:$0xff] }
 0x54d   : > { %v3008_v2 = vpack.c.bf16 %v2120_v56, %v2119_v15  ;;  %v2093_v49 = vadd.f32 %v2085_v61, %v2064_v62  ;;  %v2028_v41 = vmul.f32 %v3909_v22, %v2015_v8  ;;  %v2057_v0 = vmul.f32 %v3921_v59, %v1957_v30  ;;  %v2017_v15 = vld [vmem:[#allocation3 + $0x82] sm:$0xff] }
 0x54e   : > { %v2058_v58 = vmul.f32 %v3921_v59, %v2045_v55  ;;  %v2121_v37 = vadd.f32 %v2113_v44, %v2092_v17  ;;  %v2006_v13 = vadd.f32 %v1998_v39, %v1977_v9  ;;  %v2007_v48 = vadd.f32 %v1999_v5, %v1978_v25 }
 0x54f   : > { %3009 = vmatprep.subr.bf16.mxu1 %v3008_v2  ;;  %v2122_v38 = vadd.f32 %v2114_v1, %v2093_v49  ;;  %v1892_v57 = vmul.f32 %v3875_v7, %v1957_v30  ;;  %v1893_v45 = vmul.f32 %v3875_v7, %v2045_v55  ;;  %v1913_v60 = vmul.f32 %v3880_v63, %v1986_v47  ;;  %v2105_v1 = vld [vmem:[#allocation3 + $0x92] sm:$0xff] }
 0x550   : > { %3011 = vmatpush3.bf16.msra.mxu1 %v3008_v2  ;;  %v1914_v46 = vmul.f32 %v3880_v63, %v2074_v18  ;;  %v2035_v23 = vadd.f32 %v2027_v32, %v2006_v13  ;;  %v2036_v29 = vadd.f32 %v2028_v41, %v2007_v48  ;;  %v1942_v4 = vmul.f32 %v3888_v34, %v2015_v8  ;;  %v1988_v63 = vld [vmem:[#allocation3 + $0x81] sm:$0xff] }
 0x551   : > { %v3012_v50 = vpack.c.bf16 %v2122_v38, %v2121_v37  ;;  %v1921_v27 = vadd.f32 %v1913_v60, %v1892_v57  ;;  %v1943_v61 = vmul.f32 %v3888_v34, %v2103_v26  ;;  %v1971_v6 = vmul.f32 %v3899_v20, %v2045_v55  ;;  %v2246_v57 = vld [vmem:[%s4153_s16 + $0x18] sm:$0xff]  ;;  %v2247_v60 = vld [vmem:[%s4153_s16 + $0x20] sm:$0xff] }
 0x552   : > { %v1922_v33 = vadd.f32 %v1914_v46, %v1893_v45  ;;  %v2065_v19 = vadd.f32 %v2057_v0, %v2035_v23  ;;  %v2066_v54 = vadd.f32 %v2058_v58, %v2036_v29  ;;  %v2086_v7 = vmul.f32 %v3926_v52, %v1986_v47  ;;  %v2248_v46 = vld [vmem:[%s4153_s16 + $0x28] sm:$0xff]  ;;  %v2755_v23 = vld [vmem:[%s4151_s14] ss:$0 sm:$0xff] }
 0x553   : > { %3013 = vmatprep.subr.bf16.mxu1 %v3012_v50  ;;  %v2087_v42 = vmul.f32 %v3926_v52, %v2074_v18  ;;  %v1950_v21 = vadd.f32 %v1942_v4, %v1921_v27  ;;  %v1972_v30 = vmul.f32 %v3899_v20, %v1959_v11  ;;  %v2115_v34 = vmul.f32 %v3935_v14, %v2015_v8 }
 0x554   : > { %3015 = vmatpush3.bf16.msra.mxu1 %v3012_v50  ;;  %v1951_v24 = vadd.f32 %v1943_v61, %v1922_v33  ;;  %v2094_v28 = vadd.f32 %v2086_v7, %v2065_v19  ;;  %v2116_v31 = vmul.f32 %v3935_v14, %v2103_v26  ;;  %v2000_v44 = vmul.f32 %v3904_v51, %v2074_v18 }
 0x555   : > { %v2095_v16 = vadd.f32 %v2087_v42, %v2066_v54  ;;  %v1979_v56 = vadd.f32 %v1971_v6, %v1950_v21  ;;  %v2001_v47 = vmul.f32 %v3904_v51, %v1988_v63  ;;  %v2060_v12 = vmul.f32 %v3921_v59, %v2047_v35 }
 0x556   : > { %v1980_v36 = vadd.f32 %v1972_v30, %v1951_v24  ;;  %v2123_v62 = vadd.f32 %v2115_v34, %v2094_v28  ;;  %v2029_v2 = vmul.f32 %v3909_v22, %v2103_v26  ;;  %v2030_v8 = vmul.f32 %v3909_v22, %v2017_v15  ;;  %v2245_v26 = vld [vmem:[%s4153_s16 + $0x10] sm:$0xff] }
 0x557   : > { %v2124_v3 = vadd.f32 %v2116_v31, %v2095_v16  ;;  %v2008_v20 = vadd.f32 %v2000_v44, %v1979_v56  ;;  %v2059_v9 = vmul.f32 %v3921_v59, %v1959_v11  ;;  %v2089_v25 = vmul.f32 %v3926_v52, %v2076_v53  ;;  %v2128_v59 = vld [vmem:[%s4152_s15 + $0x8] sm:$0xff] }
 0x558   : > { %v2009_v55 = vadd.f32 %v2001_v47, %v1980_v36  ;;  %v2088_v18 = vmul.f32 %v3926_v52, %v1988_v63  ;;  %v2118_v32 = vmul.f32 %v3935_v14, %v2105_v1  ;;  %v2117_v22 = vmul.f32 %v3935_v14, %v2017_v15  ;;  %v2243_v52 = vld [vmem:[%s4153_s16] sm:$0xff]  ;;  %v2244_v14 = vld [vmem:[%s4153_s16 + $0x8] sm:$0xff] }
 0x559   : > { %v3016_v17 = vpack.c.bf16 %v2124_v3, %v2123_v62  ;;  %v2037_v39 = vadd.f32 %v2029_v2, %v2008_v20  ;;  %v3025_v13 = vpack.c.bf16 %v2244_v14, %v2243_v52  ;;  %v3220_v48 = vmov 0.0|0.0   ;;  %v2330_v47 = vld [vmem:[%s4155_s18] sm:$0x3]  ;;  %v2421_v1 = vld [vmem:[%s4157_s20 + $0x8] sm:$0xff] }
 0x55a   : > { %v2038_v49 = vadd.f32 %v2030_v8, %v2009_v55  ;;  %3045 = vmatprep.subr.bf16.mxu0 %v3220_v48  ;;  %v3028_v45 = vpack.c.bf16 %v2246_v57, %v2245_v26  ;;  %v3031_v50 = vpack.c.bf16 %v2248_v46, %v2247_v60  ;;  %v2249_v62 = vld [vmem:[%s4154_s17] sm:$0x1]  ;;  %v2537_v57 = vld [vmem:[%s4159_s22 + $0x8] sm:$0xff] }
 0x55b   : > { %3017 = vmatprep.subr.bf16.mxu1 %v3016_v17  ;;  %v2067_v51 = vadd.f32 %v2059_v9, %v2037_v39  ;;  %v2422_v39 = vld [vmem:[%s4157_s20 + $0x10] sm:$0xff]  ;;  %v2423_v9 = vld [vmem:[%s4157_s20 + $0x18] sm:$0xff]  ;;  %v2536_v26 = vld [vmem:[%s4159_s22] sm:$0xff] }
 0x55c   : > { %3019 = vmatpush3.bf16.msra.mxu1 %v3016_v17  ;;  %v2068_v5 = vadd.f32 %v2060_v12, %v2038_v49  ;;  %v2420_v17 = vld [vmem:[%s4157_s20] sm:$0xff] }
 0x55d   : > { %v2096_v41 = vadd.f32 %v2088_v18, %v2067_v51  ;;  %v3033_v49 = vpack.c.bf16 %v2421_v1, %v2420_v17  ;;  %v2424_v51 = vld [vmem:[%s4157_s20 + $0x20] sm:$0xff] }
 0x55e   : > { %v2097_v0 = vadd.f32 %v2089_v25, %v2068_v5  ;;  %v3037_v25 = vpack.c.bf16 %v2423_v9, %v2422_v39  ;;  %v2425_v5 = vld [vmem:[%s4157_s20 + $0x28] sm:$0xff]  ;;  %v2540_v46 = vld [vmem:[%s4159_s22 + $0x20] sm:$0xff] }
 0x55f   : > { %v2125_v58 = vadd.f32 %v2117_v22, %v2096_v41  ;;  %v3041_v18 = vpack.c.bf16 %v2425_v5, %v2424_v51 }
 0x560   : > { %v2126_v37 = vadd.f32 %v2118_v32, %v2097_v0  ;;  %v2331_v32 = vld [vmem:[%s4156_s19] sm:$0x1] }
 0x562   : > { %v3020_v38 = vpack.c.bf16 %v2126_v37, %v2125_v58 }
 0x564   : > { %3021 = vmatprep.subr.bf16.mxu1 %v3020_v38 }
 0x565   : > { %3023 = vmatpush3.bf16.msra.mxu1 %v3020_v38 }
 0x566   : > { %3024 = vmatprep.subr.bf16.mxu1 %v3220_v48 }
 0x568   : > { %2926 = vmatmul.mubr.msk.f32.vlgmr.msra.gmra.mrb[12].mxu1 %vm2136_vm11, %v2128_v59 }
 0x569   : > { %2940 = vmatprep.mubr.msk.f32.mxu1 %vm3219_vm6, %v4193_v43  ;;  %3026 = vmatpush3.bf16.msra.mxu1 %v3025_v13 }
 0x56a   : > { %3027 = vmatprep.subr.bf16.mxu1 %v3220_v48 }
 0x56d   : > { %3029 = vmatpush3.bf16.msra.mxu1 %v3028_v45  ;;  %v3046_v45 = vpack.c.bf16 %v2537_v57, %v2536_v26 }
 0x56e   : > { %3030 = vmatprep.subr.bf16.mxu1 %v3220_v48 }
 0x56f   : > { %3047 = vmatpush3.bf16.msra.mxu0 %v3046_v45 }
 0x570   : > { %3048 = vmatprep.subr.bf16.mxu0 %v3220_v48 }
 0x571   : > { %3032 = vmatpush3.bf16.msra.mxu1 %v3031_v50  ;;  %v2541_v50 = vld [vmem:[%s4159_s22 + $0x28] sm:$0xff] }
 0x572   : > { %2943 = vmatprep.subr.mxu1 %v4193_v43 }
 0x63b   : > { %v2927_v29 = vpop.f32.mrb[12].mxu1 }
 0x63c   : > { %v2215_v4 = vadd.f32 %v2927_v29, %v2755_v23  ;;  %v2209_v11 = vpop.f32.mrb[13].mxu1  ;;  %v2542_v29 = vld [vmem:[%s4159_s22 + $0x30] sm:$0xff] }
 0x63d   : > { %v2210_v27 = vadd.f32 %v2755_v23, %v2209_v11  ;;  %v3052_v23 = vpack.c.bf16 %v2541_v50, %v2540_v46 }
 0x63e   : > { %v2759_v33 = vmul.f32 -1.442695, %v2215_v4 }
 0x63f   : > { %v2758_v61 = vmul.f32 -1.442695, %v2210_v27 }
 0x640   : > { %3185 = vpow2.f32 %v2759_v33  ;;  %v2545_v33 = vld [vmem:[%s4159_s22 + $0x48] sm:$0xff] }
 0x641   : > { %3187 = vpow2.f32 %v2758_v61 }
 0x64a   : > { %v3186_v6 = vpop.eup %3185 }
 0x64b   : > { %v3188_v19 = vpop.eup %3187  ;;  %v2225_v54 = vadd.f32 1.0, %v3186_v6  ;;  %v2546_v6 = vld [vmem:[%s4159_s22 + $0x50] sm:$0xff] }
 0x64c   : > { %v2224_v7 = vadd.f32 1.0, %v3188_v19  ;;  %v2547_v19 = vld [vmem:[%s4159_s22 + $0x58] sm:$0xff] }
 0x64d   : > { %3189 = vrcp.f32 %v2225_v54  ;;  %v3061_v54 = vpack.c.bf16 %v2547_v19, %v2546_v6 }
 0x64e   : > { %3191 = vrcp.f32 %v2224_v7  ;;  %v2548_v7 = vld [vmem:[%s4159_s22 + $0x60] sm:$0xff] }
 0x657   : > { %v3190_v42 = vpop.eup %3189 }
 0x658   : > { %v3192_v63 = vpop.eup %3191  ;;  %v2231_v21 = vmul.f32 %v3190_v42, %v2215_v4  ;;  %v2543_v4 = vld [vmem:[%s4159_s22 + $0x38] sm:$0xff]  ;;  %v2549_v42 = vld [vmem:[%s4159_s22 + $0x68] sm:$0xff] }
 0x659   : > { %v2230_v24 = vmul.f32 %v3192_v63, %v2210_v27  ;;  %v3055_v11 = vpack.c.bf16 %v2543_v4, %v2542_v29  ;;  %v2544_v27 = vld [vmem:[%s4159_s22 + $0x40] sm:$0xff]  ;;  %v3064_v63 = vpack.c.bf16 %v2549_v42, %v2548_v7 }
 0x65a   : > { %v2233_v30 = vsel %vm1842_vm9, %v2231_v21, 0.0  ;;  %v3058_v61 = vpack.c.bf16 %v2545_v33, %v2544_v27 }
 0x65b   : > { %v2232_v35 = vsel %vm1842_vm9, %v2230_v24, 0.0 }
 0x65c   : > { %v2234_v28 = vadd.f32 %v2233_v30, %v2232_v35  ;;  %v2765_v35 = vld [vmem:[%s4158_s21] ss:$0 sm:$0xff] }
 0x65e   : > { %v2235_v16 = vrot.slane %v2234_v28, 4 }
 0x660   : > { %v2236_v34 = vadd.f32 %v2235_v16, %v2234_v28 }
 0x662   : > { %v2237_v31 = vrot.slane %v2236_v34, 2 }
 0x664   : > { %v2238_v15 = vadd.f32 %v2237_v31, %v2236_v34 }
 0x666   : > { %v2239_v56 = vrot.slane %v2238_v15, 1 }
 0x668   : > { %v2240_v36 = vadd.f32 %v2239_v56, %v2238_v15 }
 0x66a   : > { %v2242_v44 = vmul.f32 0.0625, %v2240_v36 }
 0x66c   : > { %2941 = vmatmul.mubr.msk.f32.vlgmr.msra.gmra.mrb[14].mxu1 %vm1842_vm9, %v2242_v44 }
 0x66d   : > { %2945 = vmatprep.mubr.msk.f32.mxu1 %vm3219_vm6, %v4193_v43  ;;  %2944 = vmatpush3.msk.msra.mxu1 %vm1412_vm7, %v2330_v47 }
 0x66e   : > { %3034 = vmatprep.subr.bf16.mxu1 %v3033_v49 }
 0x73f   : > { %v2319_v3 = vpop.f32.mrb[14].mxu1 }
 0x740   : > { %v2320_v12 = vadd.f32 %v2319_v3, %v2249_v62  ;;  %v2942_v53 = vpop.f32.mrb[15].mxu1 }
 0x742   : > { %v2761_v20 = vmul.f32 -1.442695, %v2320_v12 }
 0x744   : > { %3193 = vpow2.f32 %v2761_v20 }
 0x74e   : > { %v3194_v55 = vpop.eup %3193 }
 0x74f   : > { %v2326_v2 = vadd.f32 1.0, %v3194_v55 }
 0x751   : > { %3195 = vrcp.f32 %v2326_v2 }
 0x75b   : > { %v3196_v8 = vpop.eup %3195 }
 0x75c   : > { %v2329_v43 = vmul.f32 %v3196_v8, %v2320_v12 }
 0x75e   : > { %2946 = vmatmul.mubr.msk.f32.vlgmr.msra.gmra.mrb[16].mxu1 %vm1408_vm8, %v2329_v43 }
 0x75f   : > { %3036 = vmatpush3.bf16.msra.mxu1 %v3033_v49  ;;  %v2552_v49 = vld [vmem:[#allocation4] sm:$0x1] }
 0x760   : > { %3038 = vmatprep.subr.bf16.mxu1 %v3037_v25 }
 0x763   : > { %3040 = vmatpush3.bf16.msra.mxu1 %v3037_v25 }
 0x764   : > { %3042 = vmatprep.subr.bf16.mxu1 %v3041_v18 }
 0x767   : > { %3044 = vmatpush3.bf16.msra.mxu1 %v3041_v18 }
 0x831   : > { %v2404_v41 = vpop.f32.mrb[16].mxu1 }
 0x832   : > { %v2405_v0 = vadd.f32 %v2404_v41, %v2331_v32  ;;  %v2947_v22 = vpop.f32.mrb[17].mxu1 }
 0x834   : > { %v2764_v58 = vmul.f32 -1.442695, %v2405_v0 }
 0x836   : > { %3197 = vpow2.f32 %v2764_v58 }
 0x840   : > { %v3198_v37 = vpop.eup %3197 }
 0x841   : > { %v2411_v38 = vadd.f32 1.0, %v3198_v37 }
 0x843   : > { %3199 = vrcp.f32 %v2411_v38 }
 0x84d   : > { %v3200_v59 = vpop.eup %3199 }
 0x84e   : > { %v2417_v52 = vrot.slane %v3200_v59, %v1494_v40  ;;  %v2539_v40 = vld [vmem:[%s4159_s22 + $0x18] sm:$0xff] }
 0x84f   : > { %v3049_v60 = vpack.c.bf16 %v2539_v40, %v2538_v10 }
 0x850   : > { %v2418_v14 = vmul.f32 %v2417_v52, %v2230_v24  ;;  %v2419_v13 = vmul.f32 %v2417_v52, %v2231_v21  ;;  %v2550_v21 = vld [vmem:[%s4159_s22 + $0x70] sm:$0xff]  ;;  %v2551_v24 = vld [vmem:[%s4159_s22 + $0x78] sm:$0xff] }
 0x851   : > { %3050 = vmatpush3.bf16.msra.mxu0 %v3049_v60  ;;  %v3067_v30 = vpack.c.bf16 %v2551_v24, %v2550_v21 }
 0x852   : > { %2960 = vmatprep.mubr.msk.f32.mxu1 %vm1842_vm9, %v2418_v14  ;;  %3051 = vmatprep.subr.bf16.mxu0 %v3220_v48 }
 0x853   : > { %2961 = vmatmul.mubr.msk.f32.vlgmr.msra.gmra.mrb[18].mxu1 %vm1842_vm9, %v2419_v13 }
 0x855   : > { %3053 = vmatpush3.bf16.msra.mxu0 %v3052_v23 }
 0x856   : > { %3054 = vmatprep.subr.bf16.mxu0 %v3220_v48 }
 0x859   : > { %3056 = vmatpush3.bf16.msra.mxu0 %v3055_v11 }
 0x85a   : > { %3057 = vmatprep.subr.bf16.mxu0 %v3220_v48 }
 0x85d   : > { %3059 = vmatpush3.bf16.msra.mxu0 %v3058_v61 }
 0x85e   : > { %3060 = vmatprep.subr.bf16.mxu0 %v3220_v48 }
 0x861   : > { %3062 = vmatpush3.bf16.msra.mxu0 %v3061_v54 }
 0x862   : > { %3063 = vmatprep.subr.bf16.mxu0 %v3220_v48 }
 0x865   : > { %3065 = vmatpush3.bf16.msra.mxu0 %v3064_v63 }
 0x866   : > { %3066 = vmatprep.subr.bf16.mxu0 %v3220_v48 }
 0x869   : > { %3068 = vmatpush3.bf16.msra.mxu0 %v3067_v30 }
 0x926   : > { %v2962_v28 = vpop.f32.mrb[18].mxu1 }
 0x927   : > { %v2511_v16 = vadd.f32 %v2962_v28, %v2765_v35  ;;  %v2505_v34 = vpop.f32.mrb[19].mxu1 }
 0x928   : > { %v2506_v31 = vadd.f32 %v2765_v35, %v2505_v34 }
 0x929   : > { %v2769_v15 = vmul.f32 -1.442695, %v2511_v16 }
 0x92a   : > { %v2768_v56 = vmul.f32 -1.442695, %v2506_v31 }
 0x92b   : > { %3201 = vpow2.f32 %v2769_v15 }
 0x92c   : > { %3203 = vpow2.f32 %v2768_v56 }
 0x935   : > { %v3202_v36 = vpop.eup %3201 }
 0x936   : > { %v3204_v44 = vpop.eup %3203  ;;  %v2521_v47 = vadd.f32 1.0, %v3202_v36 }
 0x937   : > { %v2520_v62 = vadd.f32 1.0, %v3204_v44 }
 0x938   : > { %3205 = vrcp.f32 %v2521_v47 }
 0x939   : > { %3207 = vrcp.f32 %v2520_v62 }
 0x942   : > { %v3206_v48 = vpop.eup %3205 }
 0x943   : > { %v3208_v3 = vpop.eup %3207  ;;  %v2527_v12 = vmul.f32 %v3206_v48, %v2511_v16 }
 0x944   : > { %v2526_v53 = vmul.f32 %v3208_v3, %v2506_v31 }
 0x946   : > { %v2528_v20 = vadd.f32 %v2527_v12, %v2526_v53 }
 0x948   : > { %v2529_v55 = vrot.slane %v2528_v20, 4 }
 0x94a   : > { %v2530_v2 = vadd.f32 %v2529_v55, %v2528_v20 }
 0x94c   : > { %v2531_v8 = vrot.slane %v2530_v2, 2 }
 0x94e   : > { %v2532_v43 = vadd.f32 %v2531_v8, %v2530_v2 }
 0x950   : > { %v2533_v17 = vrot.slane %v2532_v43, 1 }
 0x952   : > { %v2534_v1 = vadd.f32 %v2533_v17, %v2532_v43 }
 0x954   : > { %v2535_v39 = vmul.f32 0.0625, %v2534_v1 }
 0x956   : > { %2996 = vmatmul.mubr.f32.vlgmr.msra.gmra.mrb[16].mxu0 %v2535_v39 }
 0xa29   : > { %v2619_v9 = vpop.f32.mrb[16].mxu0 }
 0xa2a   : > { %v2620_v25 = vadd.f32 %v2619_v9, %v2552_v49  ;;  %v2997_v51 = vpop.f32.mrb[17].mxu0 }
 0xa2c   : > { %2624 = vst.msk [vmem:[%s735_s23] sm:$0x1] %vm2623_vm12, %v2620_v25 }
 0xa2d PF: > { %s36_s27 = sadd.s32 1, %s3215_s27  }
 0xa2e   : > { %p33_p4 = scmp.ge.s32.totalorder %s36_s27, 4  }
 0xa30   :  { %35 = sbr.rel (!%p33_p4) target bundleno = 10 (0xa), region = 150 }

</bundles_post_ra>
